<compile_context>
chip_gen: v7x
topology: tpu7x:2x2x1
jax: 0.10.0
libtpu: 0.0.40
codegen_flags: <defaults>
</compile_context>

<pallas_src>
import jax
import jax.numpy as jnp
from jax import lax
from jax.experimental import pallas as pl
from jax.experimental.pallas import tpu as pltpu
import numpy as np

# ---- "hp" hyperparameters (small synthetic config consistent with the module) ----
NMELS = 40       # hp.data.nmels
HIDDEN = 32      # hp.model.hidden
PROJ = 16        # hp.model.proj
NUM_LAYERS = 3   # hp.model.num_layer
B = 2            # batch
T = 8            # sequence length
BPAD = 8         # f32 sublane count; batch padded so per-step slices are whole tiles


def _r8(n):
    return -(-n // 8) * 8


# Row offsets inside the single packed weight array (columns = 2*4H = 256).
_OFF = {}
_r = 0
_OFF["wih0"] = _r; _r += _r8(NMELS)          # (NMELS, 4H) layer-0 input weights
_OFF["b0"] = _r; _r += 8                     # (1, 4H) layer-0 combined bias
for _l in range(NUM_LAYERS - 1):
    _OFF[f"fused{_l}"] = _r; _r += _r8(HIDDEN)   # (H, 8H) = [Whh_l | Wih_{l+1}]
    _OFF[f"b{_l + 1}"] = _r; _r += 8             # (1, 4H) layer l+1 combined bias
_OFF["whh_last"] = _r; _r += _r8(HIDDEN)     # (H, 4H) last layer recurrent weights
_OFF["wp"] = _r; _r += _r8(HIDDEN)           # (H, PROJ) projection weight
_OFF["bp"] = _r; _r += 8                     # (1, PROJ) projection bias
PACK_ROWS = _r                               # 200
PACK_COLS = 2 * 4 * HIDDEN                   # 256


def speech_embedder_kernel(x_ref, pack_ref, out_ref):
    """x_ref: (T*BPAD, NMELS) time-major, row t*BPAD+b = sample b at time t
       pack_ref: (PACK_ROWS, PACK_COLS) packed weights (gate order [i, f, o, g])
       out_ref: (B, PROJ)
    """
    H = HIDDEN
    G = 4 * H
    L = NUM_LAYERS
    Bp = BPAD

    # ---- hoisted weight reads (one VMEM load each, reused across the unroll) ----
    wih0 = pack_ref[_OFF["wih0"]:_OFF["wih0"] + NMELS, 0:G]           # (NMELS, 4H)
    b0 = pack_ref[_OFF["b0"]:_OFF["b0"] + 1, 0:G]                     # (1, 4H)
    fused = [pack_ref[_OFF[f"fused{l}"]:_OFF[f"fused{l}"] + H, :]     # (H, 8H)
             for l in range(L - 1)]
    bnext = [jnp.broadcast_to(
                 pack_ref[_OFF[f"b{l + 1}"]:_OFF[f"b{l + 1}"] + 1, 0:G], (Bp, G))
             for l in range(L - 1)]
    whh_last = pack_ref[_OFF["whh_last"]:_OFF["whh_last"] + H, 0:G]   # (H, 4H)

    # ---- layer-0 input projection hoisted out of the recurrence (one matmul) ----
    xw0 = jnp.dot(x_ref[...], wih0, preferred_element_type=jnp.float32) + b0  # (T*Bp, 4H)

    zeros_h = jnp.zeros((Bp, H), jnp.float32)
    zeros_g = jnp.zeros((Bp, G), jnp.float32)
    h = [zeros_h] * L
    c = [zeros_h] * L
    rec = [zeros_g] * L          # h_{t-1}^{(l)} @ Whh_l (zero for t = 0)
    xin = [None] * L             # pending (Wih_l x_t + b_l) for layer l at its next t

    # ---- wavefront over diagonals d = l + t (fully unrolled, static slices) ----
    for d in range(T + L - 1):
        for l in range(L - 1, -1, -1):   # high layer first: consume xin[l] before
            t = d - l                    # the lower layer rebinds it this diagonal
            if t < 0 or t >= T:
                continue
            gin = xw0[t * Bp:(t + 1) * Bp, :] if l == 0 else xin[l]
            gates = gin + rec[l]                        # (Bp, 4H), order [i, f, o, g]
            ifo = jax.nn.sigmoid(gates[:, :3 * H])      # one EUP pass, contiguous lanes
            g = jnp.tanh(gates[:, 3 * H:])
            c[l] = ifo[:, H:2 * H] * c[l] + ifo[:, :H] * g
            h[l] = ifo[:, 2 * H:3 * H] * jnp.tanh(c[l])
            if l < L - 1:
                # One fused matmul: this layer's next recurrent term AND the
                # next layer's input projection for time t.
                fo = jnp.dot(h[l], fused[l], preferred_element_type=jnp.float32)  # (Bp, 8H)
                rec[l] = fo[:, :G]
                xin[l + 1] = fo[:, G:] + bnext[l]
            elif t < T - 1:
                rec[l] = jnp.dot(h[l], whh_last, preferred_element_type=jnp.float32)

    # ---- x = x[:, -1] -> Linear -> L2 normalize along dim 1 ----
    wp = pack_ref[_OFF["wp"]:_OFF["wp"] + H, 0:PROJ]
    bp = pack_ref[_OFF["bp"]:_OFF["bp"] + 1, 0:PROJ]
    y = jnp.dot(h[L - 1], wp, preferred_element_type=jnp.float32) + bp     # (Bp, P)
    inv = lax.rsqrt(jnp.sum(y * y, axis=1, keepdims=True) + 1e-12)
    out_ref[...] = (y * inv)[:B, :]    # only the real batch rows are written


# --------------------- one-time parameter preparation -------------------------
def prepare_params(lstm_params, wp, bp):
    """Permute gates [i,f,g,o]->[i,f,o,g], transpose, fuse biases, fuse
    Whh_l with Wih_{l+1}, and pack everything into one f32 array. Run ONCE."""
    H = HIDDEN
    G = 4 * H

    def perm(w):   # reorder gate blocks along axis 0
        return np.concatenate([w[0:H], w[H:2 * H], w[3 * H:4 * H], w[2 * H:3 * H]], axis=0)

    wih_t, whh_t, bias = [], [], []
    for (w_ih, w_hh, b_ih, b_hh) in lstm_params:
        wih_t.append(perm(np.asarray(w_ih, np.float32)).T)        # (in, 4H)
        whh_t.append(perm(np.asarray(w_hh, np.float32)).T)        # (H, 4H)
        bias.append(perm(np.asarray(b_ih + b_hh, np.float32)))    # (4H,)

    pack = np.zeros((PACK_ROWS, PACK_COLS), np.float32)
    pack[_OFF["wih0"]:_OFF["wih0"] + NMELS, 0:G] = wih_t[0]
    pack[_OFF["b0"], 0:G] = bias[0]
    for l in range(NUM_LAYERS - 1):
        pack[_OFF[f"fused{l}"]:_OFF[f"fused{l}"] + H, 0:2 * G] = np.concatenate(
            [whh_t[l], wih_t[l + 1]], axis=1)
        pack[_OFF[f"b{l + 1}"], 0:G] = bias[l + 1]
    pack[_OFF["whh_last"]:_OFF["whh_last"] + H, 0:G] = whh_t[NUM_LAYERS - 1]
    pack[_OFF["wp"]:_OFF["wp"] + H, 0:PROJ] = np.asarray(wp, np.float32).T
    pack[_OFF["bp"], 0:PROJ] = np.asarray(bp, np.float32)
    return jnp.asarray(pack)


@jax.jit
def speech_embedder_pallas(x, packed_weights):
    """x: (B, T, NMELS). packed_weights: output of prepare_params()."""
    xf = jnp.asarray(x, jnp.float32)
    x_tm = jnp.transpose(xf, (1, 0, 2))                        # (T, B, F) time-major
    x_tm = jnp.pad(x_tm, ((0, 0), (0, BPAD - B), (0, 0)))      # pad batch to 8 sublanes
    x_tm = x_tm.reshape(T * BPAD, NMELS)
    return pl.pallas_call(
        speech_embedder_kernel,
        out_shape=jax.ShapeDtypeStruct((B, PROJ), jnp.float32),
        in_specs=[pl.BlockSpec(memory_space=pltpu.MemorySpace.VMEM),
                  pl.BlockSpec(memory_space=pltpu.MemorySpace.VMEM)],
        out_specs=pl.BlockSpec(memory_space=pltpu.MemorySpace.VMEM),
    )(x_tm, packed_weights)


# ----------------------- pure-JAX reference (same math) -----------------------
def speech_embedder_ref(x, lstm_params, wp, bp):
    xs = x.astype(jnp.float32)
    for (w_ih, w_hh, b_ih, b_hh) in lstm_params:
        def cell(carry, x_t):
            h, c = carry
            gates = x_t @ w_ih.T + b_ih + h @ w_hh.T + b_hh
            i, f, g, o = jnp.split(gates, 4, axis=1)
            i = jax.nn.sigmoid(i); f = jax.nn.sigmoid(f)
            g = jnp.tanh(g); o = jax.nn.sigmoid(o)
            c = f * c + i * g
            h = o * jnp.tanh(c)
            return (h, c), h
        h0 = jnp.zeros((xs.shape[0], HIDDEN), jnp.float32)
        (_, _), hs = lax.scan(cell, (h0, h0), jnp.swapaxes(xs, 0, 1))
        xs = jnp.swapaxes(hs, 0, 1)
    last = xs[:, -1]
    y = last @ wp.T + bp
    return y / jnp.linalg.norm(y, axis=1, keepdims=True)


# ----------------------------- parameter init ---------------------------------
def xavier_normal(key, shape):
    fan_out, fan_in = shape
    std = (2.0 / (fan_in + fan_out)) ** 0.5
    return std * jax.random.normal(key, shape, jnp.float32)


def init_params(key):
    lstm_params = []
    for l in range(NUM_LAYERS):
        in_features = NMELS if l == 0 else HIDDEN
        key, k1, k2 = jax.random.split(key, 3)
        w_ih = xavier_normal(k1, (4 * HIDDEN, in_features))
        w_hh = xavier_normal(k2, (4 * HIDDEN, HIDDEN))
        b_ih = jnp.zeros((4 * HIDDEN,), jnp.float32)   # nn.init.constant_(bias, 0.0)
        b_hh = jnp.zeros((4 * HIDDEN,), jnp.float32)
        lstm_params.append((w_ih, w_hh, b_ih, b_hh))
    key, kw, kb = jax.random.split(key, 3)
    bound = 1.0 / (HIDDEN ** 0.5)
    wp = jax.random.uniform(kw, (PROJ, HIDDEN), jnp.float32, -bound, bound)
    bp = jax.random.uniform(kb, (PROJ,), jnp.float32, -bound, bound)
    return lstm_params, wp, bp


if __name__ == "__main__":
    key = jax.random.PRNGKey(0)
    key, kx, kp = jax.random.split(key, 3)
    x = jax.random.normal(kx, (B, T, NMELS), jnp.float32)
    lstm_params, wp, bp = init_params(kp)

    packed = prepare_params(lstm_params, wp, bp)   # one-time weight prep/packing

    out = jax.block_until_ready(speech_embedder_pallas(x, packed))
    ref = jax.block_until_ready(speech_embedder_ref(x, lstm_params, wp, bp))

    assert out.shape == (B, PROJ)
    np.testing.assert_allclose(np.asarray(out), np.asarray(ref), rtol=1e-4, atol=1e-4)
    # embeddings are unit-norm per row
    np.testing.assert_allclose(np.linalg.norm(np.asarray(out), axis=1),
                               np.ones(B), rtol=1e-5, atol=1e-5)
    print("KERNEL_OK")
</pallas_src>

<mosaic_0001>
module attributes {stable_mosaic.version = 11 : i64} {
  func.func @speech_embedder_kernel(%arg0: memref<64x40xf32, #tpu.memory_space<vmem>>, %arg1: memref<200x256xf32, #tpu.memory_space<vmem>>, %arg2: memref<2x16xf32, #tpu.memory_space<vmem>>) attributes {dimension_semantics = [], scalar_prefetch = 0 : i64, scratch_operands = 0 : i64, tpu.core_type = #tpu.core_type<tc>} {
    %c0 = arith.constant 0 : index
    %c0_0 = arith.constant 0 : index
    %0 = vector.load %arg1[%c0, %c0_0] : memref<200x256xf32, #tpu.memory_space<vmem>>, vector<40x128xf32>
    %c40 = arith.constant 40 : index
    %c0_1 = arith.constant 0 : index
    %1 = vector.load %arg1[%c40, %c0_1] : memref<200x256xf32, #tpu.memory_space<vmem>>, vector<1x128xf32>
    %c48 = arith.constant 48 : index
    %c0_2 = arith.constant 0 : index
    %2 = vector.load %arg1[%c48, %c0_2] : memref<200x256xf32, #tpu.memory_space<vmem>>, vector<32x256xf32>
    %c88 = arith.constant 88 : index
    %c0_3 = arith.constant 0 : index
    %3 = vector.load %arg1[%c88, %c0_3] : memref<200x256xf32, #tpu.memory_space<vmem>>, vector<32x256xf32>
    %c80 = arith.constant 80 : index
    %c0_4 = arith.constant 0 : index
    %4 = vector.load %arg1[%c80, %c0_4] : memref<200x256xf32, #tpu.memory_space<vmem>>, vector<1x128xf32>
    %5 = vector.shape_cast %4 : vector<1x128xf32> to vector<1x128xf32>
    %6 = vector.broadcast %5 : vector<1x128xf32> to vector<8x128xf32>
    %c120 = arith.constant 120 : index
    %c0_5 = arith.constant 0 : index
    %7 = vector.load %arg1[%c120, %c0_5] : memref<200x256xf32, #tpu.memory_space<vmem>>, vector<1x128xf32>
    %8 = vector.shape_cast %7 : vector<1x128xf32> to vector<1x128xf32>
    %9 = vector.broadcast %8 : vector<1x128xf32> to vector<8x128xf32>
    %c128 = arith.constant 128 : index
    %c0_6 = arith.constant 0 : index
    %10 = vector.load %arg1[%c128, %c0_6] : memref<200x256xf32, #tpu.memory_space<vmem>>, vector<32x128xf32>
    %c0_7 = arith.constant 0 : index
    %c0_8 = arith.constant 0 : index
    %11 = vector.load %arg0[%c0_7, %c0_8] : memref<64x40xf32, #tpu.memory_space<vmem>>, vector<64x40xf32>
    %cst = arith.constant dense<0.000000e+00> : vector<64x128xf32>
    %12 = tpu.matmul %11, %0, %cst {dimension_numbers = #tpu.dot_dimension_numbers<[1], [0], [0], [1], [0, 0, 1, 1], [], []>} : vector<64x40xf32>, vector<40x128xf32>, vector<64x128xf32> -> vector<64x128xf32>
    %13 = vector.broadcast %1 : vector<1x128xf32> to vector<64x128xf32>
    %14 = arith.addf %12, %13 : vector<64x128xf32>
    %cst_9 = arith.constant 0.000000e+00 : f32
    %15 = vector.broadcast %cst_9 : f32 to vector<8x32xf32>
    %cst_10 = arith.constant 0.000000e+00 : f32
    %16 = vector.broadcast %cst_10 : f32 to vector<8x128xf32>
    %17 = vector.extract_strided_slice %14 {offsets = [0, 0], sizes = [8, 128], strides = [1, 1]} : vector<64x128xf32> to vector<8x128xf32>
    %18 = arith.addf %17, %16 : vector<8x128xf32>
    %19 = vector.extract_strided_slice %18 {offsets = [0, 0], sizes = [8, 96], strides = [1, 1]} : vector<8x128xf32> to vector<8x96xf32>
    %20 = arith.negf %19 : vector<8x96xf32>
    %21 = math.exp %20 : vector<8x96xf32>
    %cst_11 = arith.constant 1.000000e+00 : f32
    %22 = vector.broadcast %cst_11 : f32 to vector<8x96xf32>
    %23 = arith.addf %22, %21 : vector<8x96xf32>
    %24 = arith.divf %22, %23 : vector<8x96xf32>
    %25 = vector.extract_strided_slice %18 {offsets = [0, 96], sizes = [8, 32], strides = [1, 1]} : vector<8x128xf32> to vector<8x32xf32>
    %26 = math.tanh %25 : vector<8x32xf32>
    %27 = vector.extract_strided_slice %24 {offsets = [0, 32], sizes = [8, 32], strides = [1, 1]} : vector<8x96xf32> to vector<8x32xf32>
    %28 = arith.mulf %27, %15 : vector<8x32xf32>
    %29 = vector.extract_strided_slice %24 {offsets = [0, 0], sizes = [8, 32], strides = [1, 1]} : vector<8x96xf32> to vector<8x32xf32>
    %30 = arith.mulf %29, %26 : vector<8x32xf32>
    %31 = arith.addf %28, %30 : vector<8x32xf32>
    %32 = vector.extract_strided_slice %24 {offsets = [0, 64], sizes = [8, 32], strides = [1, 1]} : vector<8x96xf32> to vector<8x32xf32>
    %33 = math.tanh %31 : vector<8x32xf32>
    %34 = arith.mulf %32, %33 : vector<8x32xf32>
    %cst_12 = arith.constant dense<0.000000e+00> : vector<8x256xf32>
    %35 = tpu.matmul %34, %2, %cst_12 {dimension_numbers = #tpu.dot_dimension_numbers<[1], [0], [0], [1], [0, 0, 1, 1], [], []>} : vector<8x32xf32>, vector<32x256xf32>, vector<8x256xf32> -> vector<8x256xf32>
    %36 = vector.extract_strided_slice %35 {offsets = [0, 0], sizes = [8, 128], strides = [1, 1]} : vector<8x256xf32> to vector<8x128xf32>
    %37 = vector.extract_strided_slice %35 {offsets = [0, 128], sizes = [8, 128], strides = [1, 1]} : vector<8x256xf32> to vector<8x128xf32>
    %38 = arith.addf %37, %6 : vector<8x128xf32>
    %39 = arith.addf %38, %16 : vector<8x128xf32>
    %40 = vector.extract_strided_slice %39 {offsets = [0, 0], sizes = [8, 96], strides = [1, 1]} : vector<8x128xf32> to vector<8x96xf32>
    %41 = arith.negf %40 : vector<8x96xf32>
    %42 = math.exp %41 : vector<8x96xf32>
    %cst_13 = arith.constant 1.000000e+00 : f32
    %43 = vector.broadcast %cst_13 : f32 to vector<8x96xf32>
    %44 = arith.addf %43, %42 : vector<8x96xf32>
    %45 = arith.divf %43, %44 : vector<8x96xf32>
    %46 = vector.extract_strided_slice %39 {offsets = [0, 96], sizes = [8, 32], strides = [1, 1]} : vector<8x128xf32> to vector<8x32xf32>
    %47 = math.tanh %46 : vector<8x32xf32>
    %48 = vector.extract_strided_slice %45 {offsets = [0, 32], sizes = [8, 32], strides = [1, 1]} : vector<8x96xf32> to vector<8x32xf32>
    %49 = arith.mulf %48, %15 : vector<8x32xf32>
    %50 = vector.extract_strided_slice %45 {offsets = [0, 0], sizes = [8, 32], strides = [1, 1]} : vector<8x96xf32> to vector<8x32xf32>
    %51 = arith.mulf %50, %47 : vector<8x32xf32>
    %52 = arith.addf %49, %51 : vector<8x32xf32>
    %53 = vector.extract_strided_slice %45 {offsets = [0, 64], sizes = [8, 32], strides = [1, 1]} : vector<8x96xf32> to vector<8x32xf32>
    %54 = math.tanh %52 : vector<8x32xf32>
    %55 = arith.mulf %53, %54 : vector<8x32xf32>
    %cst_14 = arith.constant dense<0.000000e+00> : vector<8x256xf32>
    %56 = tpu.matmul %55, %3, %cst_14 {dimension_numbers = #tpu.dot_dimension_numbers<[1], [0], [0], [1], [0, 0, 1, 1], [], []>} : vector<8x32xf32>, vector<32x256xf32>, vector<8x256xf32> -> vector<8x256xf32>
    %57 = vector.extract_strided_slice %56 {offsets = [0, 0], sizes = [8, 128], strides = [1, 1]} : vector<8x256xf32> to vector<8x128xf32>
    %58 = vector.extract_strided_slice %56 {offsets = [0, 128], sizes = [8, 128], strides = [1, 1]} : vector<8x256xf32> to vector<8x128xf32>
    %59 = arith.addf %58, %9 : vector<8x128xf32>
    %60 = vector.extract_strided_slice %14 {offsets = [8, 0], sizes = [8, 128], strides = [1, 1]} : vector<64x128xf32> to vector<8x128xf32>
    %61 = arith.addf %60, %36 : vector<8x128xf32>
    %62 = vector.extract_strided_slice %61 {offsets = [0, 0], sizes = [8, 96], strides = [1, 1]} : vector<8x128xf32> to vector<8x96xf32>
    %63 = arith.negf %62 : vector<8x96xf32>
    %64 = math.exp %63 : vector<8x96xf32>
    %cst_15 = arith.constant 1.000000e+00 : f32
    %65 = vector.broadcast %cst_15 : f32 to vector<8x96xf32>
    %66 = arith.addf %65, %64 : vector<8x96xf32>
    %67 = arith.divf %65, %66 : vector<8x96xf32>
    %68 = vector.extract_strided_slice %61 {offsets = [0, 96], sizes = [8, 32], strides = [1, 1]} : vector<8x128xf32> to vector<8x32xf32>
    %69 = math.tanh %68 : vector<8x32xf32>
    %70 = vector.extract_strided_slice %67 {offsets = [0, 32], sizes = [8, 32], strides = [1, 1]} : vector<8x96xf32> to vector<8x32xf32>
    %71 = arith.mulf %70, %31 : vector<8x32xf32>
    %72 = vector.extract_strided_slice %67 {offsets = [0, 0], sizes = [8, 32], strides = [1, 1]} : vector<8x96xf32> to vector<8x32xf32>
    %73 = arith.mulf %72, %69 : vector<8x32xf32>
    %74 = arith.addf %71, %73 : vector<8x32xf32>
    %75 = vector.extract_strided_slice %67 {offsets = [0, 64], sizes = [8, 32], strides = [1, 1]} : vector<8x96xf32> to vector<8x32xf32>
    %76 = math.tanh %74 : vector<8x32xf32>
    %77 = arith.mulf %75, %76 : vector<8x32xf32>
    %cst_16 = arith.constant dense<0.000000e+00> : vector<8x256xf32>
    %78 = tpu.matmul %77, %2, %cst_16 {dimension_numbers = #tpu.dot_dimension_numbers<[1], [0], [0], [1], [0, 0, 1, 1], [], []>} : vector<8x32xf32>, vector<32x256xf32>, vector<8x256xf32> -> vector<8x256xf32>
    %79 = vector.extract_strided_slice %78 {offsets = [0, 0], sizes = [8, 128], strides = [1, 1]} : vector<8x256xf32> to vector<8x128xf32>
    %80 = vector.extract_strided_slice %78 {offsets = [0, 128], sizes = [8, 128], strides = [1, 1]} : vector<8x256xf32> to vector<8x128xf32>
    %81 = arith.addf %80, %6 : vector<8x128xf32>
    %82 = arith.addf %59, %16 : vector<8x128xf32>
    %83 = vector.extract_strided_slice %82 {offsets = [0, 0], sizes = [8, 96], strides = [1, 1]} : vector<8x128xf32> to vector<8x96xf32>
    %84 = arith.negf %83 : vector<8x96xf32>
    %85 = math.exp %84 : vector<8x96xf32>
    %cst_17 = arith.constant 1.000000e+00 : f32
    %86 = vector.broadcast %cst_17 : f32 to vector<8x96xf32>
    %87 = arith.addf %86, %85 : vector<8x96xf32>
    %88 = arith.divf %86, %87 : vector<8x96xf32>
    %89 = vector.extract_strided_slice %82 {offsets = [0, 96], sizes = [8, 32], strides = [1, 1]} : vector<8x128xf32> to vector<8x32xf32>
    %90 = math.tanh %89 : vector<8x32xf32>
    %91 = vector.extract_strided_slice %88 {offsets = [0, 32], sizes = [8, 32], strides = [1, 1]} : vector<8x96xf32> to vector<8x32xf32>
    %92 = arith.mulf %91, %15 : vector<8x32xf32>
    %93 = vector.extract_strided_slice %88 {offsets = [0, 0], sizes = [8, 32], strides = [1, 1]} : vector<8x96xf32> to vector<8x32xf32>
    %94 = arith.mulf %93, %90 : vector<8x32xf32>
    %95 = arith.addf %92, %94 : vector<8x32xf32>
    %96 = vector.extract_strided_slice %88 {offsets = [0, 64], sizes = [8, 32], strides = [1, 1]} : vector<8x96xf32> to vector<8x32xf32>
    %97 = math.tanh %95 : vector<8x32xf32>
    %98 = arith.mulf %96, %97 : vector<8x32xf32>
    %cst_18 = arith.constant dense<0.000000e+00> : vector<8x128xf32>
    %99 = tpu.matmul %98, %10, %cst_18 {dimension_numbers = #tpu.dot_dimension_numbers<[1], [0], [0], [1], [0, 0, 1, 1], [], []>} : vector<8x32xf32>, vector<32x128xf32>, vector<8x128xf32> -> vector<8x128xf32>
    %100 = arith.addf %81, %57 : vector<8x128xf32>
    %101 = vector.extract_strided_slice %100 {offsets = [0, 0], sizes = [8, 96], strides = [1, 1]} : vector<8x128xf32> to vector<8x96xf32>
    %102 = arith.negf %101 : vector<8x96xf32>
    %103 = math.exp %102 : vector<8x96xf32>
    %cst_19 = arith.constant 1.000000e+00 : f32
    %104 = vector.broadcast %cst_19 : f32 to vector<8x96xf32>
    %105 = arith.addf %104, %103 : vector<8x96xf32>
    %106 = arith.divf %104, %105 : vector<8x96xf32>
    %107 = vector.extract_strided_slice %100 {offsets = [0, 96], sizes = [8, 32], strides = [1, 1]} : vector<8x128xf32> to vector<8x32xf32>
    %108 = math.tanh %107 : vector<8x32xf32>
    %109 = vector.extract_strided_slice %106 {offsets = [0, 32], sizes = [8, 32], strides = [1, 1]} : vector<8x96xf32> to vector<8x32xf32>
    %110 = arith.mulf %109, %52 : vector<8x32xf32>
    %111 = vector.extract_strided_slice %106 {offsets = [0, 0], sizes = [8, 32], strides = [1, 1]} : vector<8x96xf32> to vector<8x32xf32>
    %112 = arith.mulf %111, %108 : vector<8x32xf32>
    %113 = arith.addf %110, %112 : vector<8x32xf32>
    %114 = vector.extract_strided_slice %106 {offsets = [0, 64], sizes = [8, 32], strides = [1, 1]} : vector<8x96xf32> to vector<8x32xf32>
    %115 = math.tanh %113 : vector<8x32xf32>
    %116 = arith.mulf %114, %115 : vector<8x32xf32>
    %cst_20 = arith.constant dense<0.000000e+00> : vector<8x256xf32>
    %117 = tpu.matmul %116, %3, %cst_20 {dimension_numbers = #tpu.dot_dimension_numbers<[1], [0], [0], [1], [0, 0, 1, 1], [], []>} : vector<8x32xf32>, vector<32x256xf32>, vector<8x256xf32> -> vector<8x256xf32>
    %118 = vector.extract_strided_slice %117 {offsets = [0, 0], sizes = [8, 128], strides = [1, 1]} : vector<8x256xf32> to vector<8x128xf32>
    %119 = vector.extract_strided_slice %117 {offsets = [0, 128], sizes = [8, 128], strides = [1, 1]} : vector<8x256xf32> to vector<8x128xf32>
    %120 = arith.addf %119, %9 : vector<8x128xf32>
    %121 = vector.extract_strided_slice %14 {offsets = [16, 0], sizes = [8, 128], strides = [1, 1]} : vector<64x128xf32> to vector<8x128xf32>
    %122 = arith.addf %121, %79 : vector<8x128xf32>
    %123 = vector.extract_strided_slice %122 {offsets = [0, 0], sizes = [8, 96], strides = [1, 1]} : vector<8x128xf32> to vector<8x96xf32>
    %124 = arith.negf %123 : vector<8x96xf32>
    %125 = math.exp %124 : vector<8x96xf32>
    %cst_21 = arith.constant 1.000000e+00 : f32
    %126 = vector.broadcast %cst_21 : f32 to vector<8x96xf32>
    %127 = arith.addf %126, %125 : vector<8x96xf32>
    %128 = arith.divf %126, %127 : vector<8x96xf32>
    %129 = vector.extract_strided_slice %122 {offsets = [0, 96], sizes = [8, 32], strides = [1, 1]} : vector<8x128xf32> to vector<8x32xf32>
    %130 = math.tanh %129 : vector<8x32xf32>
    %131 = vector.extract_strided_slice %128 {offsets = [0, 32], sizes = [8, 32], strides = [1, 1]} : vector<8x96xf32> to vector<8x32xf32>
    %132 = arith.mulf %131, %74 : vector<8x32xf32>
    %133 = vector.extract_strided_slice %128 {offsets = [0, 0], sizes = [8, 32], strides = [1, 1]} : vector<8x96xf32> to vector<8x32xf32>
    %134 = arith.mulf %133, %130 : vector<8x32xf32>
    %135 = arith.addf %132, %134 : vector<8x32xf32>
    %136 = vector.extract_strided_slice %128 {offsets = [0, 64], sizes = [8, 32], strides = [1, 1]} : vector<8x96xf32> to vector<8x32xf32>
    %137 = math.tanh %135 : vector<8x32xf32>
    %138 = arith.mulf %136, %137 : vector<8x32xf32>
    %cst_22 = arith.constant dense<0.000000e+00> : vector<8x256xf32>
    %139 = tpu.matmul %138, %2, %cst_22 {dimension_numbers = #tpu.dot_dimension_numbers<[1], [0], [0], [1], [0, 0, 1, 1], [], []>} : vector<8x32xf32>, vector<32x256xf32>, vector<8x256xf32> -> vector<8x256xf32>
    %140 = vector.extract_strided_slice %139 {offsets = [0, 0], sizes = [8, 128], strides = [1, 1]} : vector<8x256xf32> to vector<8x128xf32>
    %141 = vector.extract_strided_slice %139 {offsets = [0, 128], sizes = [8, 128], strides = [1, 1]} : vector<8x256xf32> to vector<8x128xf32>
    %142 = arith.addf %141, %6 : vector<8x128xf32>
    %143 = arith.addf %120, %99 : vector<8x128xf32>
    %144 = vector.extract_strided_slice %143 {offsets = [0, 0], sizes = [8, 96], strides = [1, 1]} : vector<8x128xf32> to vector<8x96xf32>
    %145 = arith.negf %144 : vector<8x96xf32>
    %146 = math.exp %145 : vector<8x96xf32>
    %cst_23 = arith.constant 1.000000e+00 : f32
    %147 = vector.broadcast %cst_23 : f32 to vector<8x96xf32>
    %148 = arith.addf %147, %146 : vector<8x96xf32>
    %149 = arith.divf %147, %148 : vector<8x96xf32>
    %150 = vector.extract_strided_slice %143 {offsets = [0, 96], sizes = [8, 32], strides = [1, 1]} : vector<8x128xf32> to vector<8x32xf32>
    %151 = math.tanh %150 : vector<8x32xf32>
    %152 = vector.extract_strided_slice %149 {offsets = [0, 32], sizes = [8, 32], strides = [1, 1]} : vector<8x96xf32> to vector<8x32xf32>
    %153 = arith.mulf %152, %95 : vector<8x32xf32>
    %154 = vector.extract_strided_slice %149 {offsets = [0, 0], sizes = [8, 32], strides = [1, 1]} : vector<8x96xf32> to vector<8x32xf32>
    %155 = arith.mulf %154, %151 : vector<8x32xf32>
    %156 = arith.addf %153, %155 : vector<8x32xf32>
    %157 = vector.extract_strided_slice %149 {offsets = [0, 64], sizes = [8, 32], strides = [1, 1]} : vector<8x96xf32> to vector<8x32xf32>
    %158 = math.tanh %156 : vector<8x32xf32>
    %159 = arith.mulf %157, %158 : vector<8x32xf32>
    %cst_24 = arith.constant dense<0.000000e+00> : vector<8x128xf32>
    %160 = tpu.matmul %159, %10, %cst_24 {dimension_numbers = #tpu.dot_dimension_numbers<[1], [0], [0], [1], [0, 0, 1, 1], [], []>} : vector<8x32xf32>, vector<32x128xf32>, vector<8x128xf32> -> vector<8x128xf32>
    %161 = arith.addf %142, %118 : vector<8x128xf32>
    %162 = vector.extract_strided_slice %161 {offsets = [0, 0], sizes = [8, 96], strides = [1, 1]} : vector<8x128xf32> to vector<8x96xf32>
    %163 = arith.negf %162 : vector<8x96xf32>
    %164 = math.exp %163 : vector<8x96xf32>
    %cst_25 = arith.constant 1.000000e+00 : f32
    %165 = vector.broadcast %cst_25 : f32 to vector<8x96xf32>
    %166 = arith.addf %165, %164 : vector<8x96xf32>
    %167 = arith.divf %165, %166 : vector<8x96xf32>
    %168 = vector.extract_strided_slice %161 {offsets = [0, 96], sizes = [8, 32], strides = [1, 1]} : vector<8x128xf32> to vector<8x32xf32>
    %169 = math.tanh %168 : vector<8x32xf32>
    %170 = vector.extract_strided_slice %167 {offsets = [0, 32], sizes = [8, 32], strides = [1, 1]} : vector<8x96xf32> to vector<8x32xf32>
    %171 = arith.mulf %170, %113 : vector<8x32xf32>
    %172 = vector.extract_strided_slice %167 {offsets = [0, 0], sizes = [8, 32], strides = [1, 1]} : vector<8x96xf32> to vector<8x32xf32>
    %173 = arith.mulf %172, %169 : vector<8x32xf32>
    %174 = arith.addf %171, %173 : vector<8x32xf32>
    %175 = vector.extract_strided_slice %167 {offsets = [0, 64], sizes = [8, 32], strides = [1, 1]} : vector<8x96xf32> to vector<8x32xf32>
    %176 = math.tanh %174 : vector<8x32xf32>
    %177 = arith.mulf %175, %176 : vector<8x32xf32>
    %cst_26 = arith.constant dense<0.000000e+00> : vector<8x256xf32>
    %178 = tpu.matmul %177, %3, %cst_26 {dimension_numbers = #tpu.dot_dimension_numbers<[1], [0], [0], [1], [0, 0, 1, 1], [], []>} : vector<8x32xf32>, vector<32x256xf32>, vector<8x256xf32> -> vector<8x256xf32>
    %179 = vector.extract_strided_slice %178 {offsets = [0, 0], sizes = [8, 128], strides = [1, 1]} : vector<8x256xf32> to vector<8x128xf32>
    %180 = vector.extract_strided_slice %178 {offsets = [0, 128], sizes = [8, 128], strides = [1, 1]} : vector<8x256xf32> to vector<8x128xf32>
    %181 = arith.addf %180, %9 : vector<8x128xf32>
    %182 = vector.extract_strided_slice %14 {offsets = [24, 0], sizes = [8, 128], strides = [1, 1]} : vector<64x128xf32> to vector<8x128xf32>
    %183 = arith.addf %182, %140 : vector<8x128xf32>
    %184 = vector.extract_strided_slice %183 {offsets = [0, 0], sizes = [8, 96], strides = [1, 1]} : vector<8x128xf32> to vector<8x96xf32>
    %185 = arith.negf %184 : vector<8x96xf32>
    %186 = math.exp %185 : vector<8x96xf32>
    %cst_27 = arith.constant 1.000000e+00 : f32
    %187 = vector.broadcast %cst_27 : f32 to vector<8x96xf32>
    %188 = arith.addf %187, %186 : vector<8x96xf32>
    %189 = arith.divf %187, %188 : vector<8x96xf32>
    %190 = vector.extract_strided_slice %183 {offsets = [0, 96], sizes = [8, 32], strides = [1, 1]} : vector<8x128xf32> to vector<8x32xf32>
    %191 = math.tanh %190 : vector<8x32xf32>
    %192 = vector.extract_strided_slice %189 {offsets = [0, 32], sizes = [8, 32], strides = [1, 1]} : vector<8x96xf32> to vector<8x32xf32>
    %193 = arith.mulf %192, %135 : vector<8x32xf32>
    %194 = vector.extract_strided_slice %189 {offsets = [0, 0], sizes = [8, 32], strides = [1, 1]} : vector<8x96xf32> to vector<8x32xf32>
    %195 = arith.mulf %194, %191 : vector<8x32xf32>
    %196 = arith.addf %193, %195 : vector<8x32xf32>
    %197 = vector.extract_strided_slice %189 {offsets = [0, 64], sizes = [8, 32], strides = [1, 1]} : vector<8x96xf32> to vector<8x32xf32>
    %198 = math.tanh %196 : vector<8x32xf32>
    %199 = arith.mulf %197, %198 : vector<8x32xf32>
    %cst_28 = arith.constant dense<0.000000e+00> : vector<8x256xf32>
    %200 = tpu.matmul %199, %2, %cst_28 {dimension_numbers = #tpu.dot_dimension_numbers<[1], [0], [0], [1], [0, 0, 1, 1], [], []>} : vector<8x32xf32>, vector<32x256xf32>, vector<8x256xf32> -> vector<8x256xf32>
    %201 = vector.extract_strided_slice %200 {offsets = [0, 0], sizes = [8, 128], strides = [1, 1]} : vector<8x256xf32> to vector<8x128xf32>
    %202 = vector.extract_strided_slice %200 {offsets = [0, 128], sizes = [8, 128], strides = [1, 1]} : vector<8x256xf32> to vector<8x128xf32>
    %203 = arith.addf %202, %6 : vector<8x128xf32>
    %204 = arith.addf %181, %160 : vector<8x128xf32>
    %205 = vector.extract_strided_slice %204 {offsets = [0, 0], sizes = [8, 96], strides = [1, 1]} : vector<8x128xf32> to vector<8x96xf32>
    %206 = arith.negf %205 : vector<8x96xf32>
    %207 = math.exp %206 : vector<8x96xf32>
    %cst_29 = arith.constant 1.000000e+00 : f32
    %208 = vector.broadcast %cst_29 : f32 to vector<8x96xf32>
    %209 = arith.addf %208, %207 : vector<8x96xf32>
    %210 = arith.divf %208, %209 : vector<8x96xf32>
    %211 = vector.extract_strided_slice %204 {offsets = [0, 96], sizes = [8, 32], strides = [1, 1]} : vector<8x128xf32> to vector<8x32xf32>
    %212 = math.tanh %211 : vector<8x32xf32>
    %213 = vector.extract_strided_slice %210 {offsets = [0, 32], sizes = [8, 32], strides = [1, 1]} : vector<8x96xf32> to vector<8x32xf32>
    %214 = arith.mulf %213, %156 : vector<8x32xf32>
    %215 = vector.extract_strided_slice %210 {offsets = [0, 0], sizes = [8, 32], strides = [1, 1]} : vector<8x96xf32> to vector<8x32xf32>
    %216 = arith.mulf %215, %212 : vector<8x32xf32>
    %217 = arith.addf %214, %216 : vector<8x32xf32>
    %218 = vector.extract_strided_slice %210 {offsets = [0, 64], sizes = [8, 32], strides = [1, 1]} : vector<8x96xf32> to vector<8x32xf32>
    %219 = math.tanh %217 : vector<8x32xf32>
    %220 = arith.mulf %218, %219 : vector<8x32xf32>
    %cst_30 = arith.constant dense<0.000000e+00> : vector<8x128xf32>
    %221 = tpu.matmul %220, %10, %cst_30 {dimension_numbers = #tpu.dot_dimension_numbers<[1], [0], [0], [1], [0, 0, 1, 1], [], []>} : vector<8x32xf32>, vector<32x128xf32>, vector<8x128xf32> -> vector<8x128xf32>
    %222 = arith.addf %203, %179 : vector<8x128xf32>
    %223 = vector.extract_strided_slice %222 {offsets = [0, 0], sizes = [8, 96], strides = [1, 1]} : vector<8x128xf32> to vector<8x96xf32>
    %224 = arith.negf %223 : vector<8x96xf32>
    %225 = math.exp %224 : vector<8x96xf32>
    %cst_31 = arith.constant 1.000000e+00 : f32
    %226 = vector.broadcast %cst_31 : f32 to vector<8x96xf32>
    %227 = arith.addf %226, %225 : vector<8x96xf32>
    %228 = arith.divf %226, %227 : vector<8x96xf32>
    %229 = vector.extract_strided_slice %222 {offsets = [0, 96], sizes = [8, 32], strides = [1, 1]} : vector<8x128xf32> to vector<8x32xf32>
    %230 = math.tanh %229 : vector<8x32xf32>
    %231 = vector.extract_strided_slice %228 {offsets = [0, 32], sizes = [8, 32], strides = [1, 1]} : vector<8x96xf32> to vector<8x32xf32>
    %232 = arith.mulf %231, %174 : vector<8x32xf32>
    %233 = vector.extract_strided_slice %228 {offsets = [0, 0], sizes = [8, 32], strides = [1, 1]} : vector<8x96xf32> to vector<8x32xf32>
    %234 = arith.mulf %233, %230 : vector<8x32xf32>
    %235 = arith.addf %232, %234 : vector<8x32xf32>
    %236 = vector.extract_strided_slice %228 {offsets = [0, 64], sizes = [8, 32], strides = [1, 1]} : vector<8x96xf32> to vector<8x32xf32>
    %237 = math.tanh %235 : vector<8x32xf32>
    %238 = arith.mulf %236, %237 : vector<8x32xf32>
    %cst_32 = arith.constant dense<0.000000e+00> : vector<8x256xf32>
    %239 = tpu.matmul %238, %3, %cst_32 {dimension_numbers = #tpu.dot_dimension_numbers<[1], [0], [0], [1], [0, 0, 1, 1], [], []>} : vector<8x32xf32>, vector<32x256xf32>, vector<8x256xf32> -> vector<8x256xf32>
    %240 = vector.extract_strided_slice %239 {offsets = [0, 0], sizes = [8, 128], strides = [1, 1]} : vector<8x256xf32> to vector<8x128xf32>
    %241 = vector.extract_strided_slice %239 {offsets = [0, 128], sizes = [8, 128], strides = [1, 1]} : vector<8x256xf32> to vector<8x128xf32>
    %242 = arith.addf %241, %9 : vector<8x128xf32>
    %243 = vector.extract_strided_slice %14 {offsets = [32, 0], sizes = [8, 128], strides = [1, 1]} : vector<64x128xf32> to vector<8x128xf32>
    %244 = arith.addf %243, %201 : vector<8x128xf32>
    %245 = vector.extract_strided_slice %244 {offsets = [0, 0], sizes = [8, 96], strides = [1, 1]} : vector<8x128xf32> to vector<8x96xf32>
    %246 = arith.negf %245 : vector<8x96xf32>
    %247 = math.exp %246 : vector<8x96xf32>
    %cst_33 = arith.constant 1.000000e+00 : f32
    %248 = vector.broadcast %cst_33 : f32 to vector<8x96xf32>
    %249 = arith.addf %248, %247 : vector<8x96xf32>
    %250 = arith.divf %248, %249 : vector<8x96xf32>
    %251 = vector.extract_strided_slice %244 {offsets = [0, 96], sizes = [8, 32], strides = [1, 1]} : vector<8x128xf32> to vector<8x32xf32>
    %252 = math.tanh %251 : vector<8x32xf32>
    %253 = vector.extract_strided_slice %250 {offsets = [0, 32], sizes = [8, 32], strides = [1, 1]} : vector<8x96xf32> to vector<8x32xf32>
    %254 = arith.mulf %253, %196 : vector<8x32xf32>
    %255 = vector.extract_strided_slice %250 {offsets = [0, 0], sizes = [8, 32], strides = [1, 1]} : vector<8x96xf32> to vector<8x32xf32>
    %256 = arith.mulf %255, %252 : vector<8x32xf32>
    %257 = arith.addf %254, %256 : vector<8x32xf32>
    %258 = vector.extract_strided_slice %250 {offsets = [0, 64], sizes = [8, 32], strides = [1, 1]} : vector<8x96xf32> to vector<8x32xf32>
    %259 = math.tanh %257 : vector<8x32xf32>
    %260 = arith.mulf %258, %259 : vector<8x32xf32>
    %cst_34 = arith.constant dense<0.000000e+00> : vector<8x256xf32>
    %261 = tpu.matmul %260, %2, %cst_34 {dimension_numbers = #tpu.dot_dimension_numbers<[1], [0], [0], [1], [0, 0, 1, 1], [], []>} : vector<8x32xf32>, vector<32x256xf32>, vector<8x256xf32> -> vector<8x256xf32>
    %262 = vector.extract_strided_slice %261 {offsets = [0, 0], sizes = [8, 128], strides = [1, 1]} : vector<8x256xf32> to vector<8x128xf32>
    %263 = vector.extract_strided_slice %261 {offsets = [0, 128], sizes = [8, 128], strides = [1, 1]} : vector<8x256xf32> to vector<8x128xf32>
    %264 = arith.addf %263, %6 : vector<8x128xf32>
    %265 = arith.addf %242, %221 : vector<8x128xf32>
    %266 = vector.extract_strided_slice %265 {offsets = [0, 0], sizes = [8, 96], strides = [1, 1]} : vector<8x128xf32> to vector<8x96xf32>
    %267 = arith.negf %266 : vector<8x96xf32>
    %268 = math.exp %267 : vector<8x96xf32>
    %cst_35 = arith.constant 1.000000e+00 : f32
    %269 = vector.broadcast %cst_35 : f32 to vector<8x96xf32>
    %270 = arith.addf %269, %268 : vector<8x96xf32>
    %271 = arith.divf %269, %270 : vector<8x96xf32>
    %272 = vector.extract_strided_slice %265 {offsets = [0, 96], sizes = [8, 32], strides = [1, 1]} : vector<8x128xf32> to vector<8x32xf32>
    %273 = math.tanh %272 : vector<8x32xf32>
    %274 = vector.extract_strided_slice %271 {offsets = [0, 32], sizes = [8, 32], strides = [1, 1]} : vector<8x96xf32> to vector<8x32xf32>
    %275 = arith.mulf %274, %217 : vector<8x32xf32>
    %276 = vector.extract_strided_slice %271 {offsets = [0, 0], sizes = [8, 32], strides = [1, 1]} : vector<8x96xf32> to vector<8x32xf32>
    %277 = arith.mulf %276, %273 : vector<8x32xf32>
    %278 = arith.addf %275, %277 : vector<8x32xf32>
    %279 = vector.extract_strided_slice %271 {offsets = [0, 64], sizes = [8, 32], strides = [1, 1]} : vector<8x96xf32> to vector<8x32xf32>
    %280 = math.tanh %278 : vector<8x32xf32>
    %281 = arith.mulf %279, %280 : vector<8x32xf32>
    %cst_36 = arith.constant dense<0.000000e+00> : vector<8x128xf32>
    %282 = tpu.matmul %281, %10, %cst_36 {dimension_numbers = #tpu.dot_dimension_numbers<[1], [0], [0], [1], [0, 0, 1, 1], [], []>} : vector<8x32xf32>, vector<32x128xf32>, vector<8x128xf32> -> vector<8x128xf32>
    %283 = arith.addf %264, %240 : vector<8x128xf32>
    %284 = vector.extract_strided_slice %283 {offsets = [0, 0], sizes = [8, 96], strides = [1, 1]} : vector<8x128xf32> to vector<8x96xf32>
    %285 = arith.negf %284 : vector<8x96xf32>
    %286 = math.exp %285 : vector<8x96xf32>
    %cst_37 = arith.constant 1.000000e+00 : f32
    %287 = vector.broadcast %cst_37 : f32 to vector<8x96xf32>
    %288 = arith.addf %287, %286 : vector<8x96xf32>
    %289 = arith.divf %287, %288 : vector<8x96xf32>
    %290 = vector.extract_strided_slice %283 {offsets = [0, 96], sizes = [8, 32], strides = [1, 1]} : vector<8x128xf32> to vector<8x32xf32>
    %291 = math.tanh %290 : vector<8x32xf32>
    %292 = vector.extract_strided_slice %289 {offsets = [0, 32], sizes = [8, 32], strides = [1, 1]} : vector<8x96xf32> to vector<8x32xf32>
    %293 = arith.mulf %292, %235 : vector<8x32xf32>
    %294 = vector.extract_strided_slice %289 {offsets = [0, 0], sizes = [8, 32], strides = [1, 1]} : vector<8x96xf32> to vector<8x32xf32>
    %295 = arith.mulf %294, %291 : vector<8x32xf32>
    %296 = arith.addf %293, %295 : vector<8x32xf32>
    %297 = vector.extract_strided_slice %289 {offsets = [0, 64], sizes = [8, 32], strides = [1, 1]} : vector<8x96xf32> to vector<8x32xf32>
    %298 = math.tanh %296 : vector<8x32xf32>
    %299 = arith.mulf %297, %298 : vector<8x32xf32>
    %cst_38 = arith.constant dense<0.000000e+00> : vector<8x256xf32>
    %300 = tpu.matmul %299, %3, %cst_38 {dimension_numbers = #tpu.dot_dimension_numbers<[1], [0], [0], [1], [0, 0, 1, 1], [], []>} : vector<8x32xf32>, vector<32x256xf32>, vector<8x256xf32> -> vector<8x256xf32>
    %301 = vector.extract_strided_slice %300 {offsets = [0, 0], sizes = [8, 128], strides = [1, 1]} : vector<8x256xf32> to vector<8x128xf32>
    %302 = vector.extract_strided_slice %300 {offsets = [0, 128], sizes = [8, 128], strides = [1, 1]} : vector<8x256xf32> to vector<8x128xf32>
    %303 = arith.addf %302, %9 : vector<8x128xf32>
    %304 = vector.extract_strided_slice %14 {offsets = [40, 0], sizes = [8, 128], strides = [1, 1]} : vector<64x128xf32> to vector<8x128xf32>
    %305 = arith.addf %304, %262 : vector<8x128xf32>
    %306 = vector.extract_strided_slice %305 {offsets = [0, 0], sizes = [8, 96], strides = [1, 1]} : vector<8x128xf32> to vector<8x96xf32>
    %307 = arith.negf %306 : vector<8x96xf32>
    %308 = math.exp %307 : vector<8x96xf32>
    %cst_39 = arith.constant 1.000000e+00 : f32
    %309 = vector.broadcast %cst_39 : f32 to vector<8x96xf32>
    %310 = arith.addf %309, %308 : vector<8x96xf32>
    %311 = arith.divf %309, %310 : vector<8x96xf32>
    %312 = vector.extract_strided_slice %305 {offsets = [0, 96], sizes = [8, 32], strides = [1, 1]} : vector<8x128xf32> to vector<8x32xf32>
    %313 = math.tanh %312 : vector<8x32xf32>
    %314 = vector.extract_strided_slice %311 {offsets = [0, 32], sizes = [8, 32], strides = [1, 1]} : vector<8x96xf32> to vector<8x32xf32>
    %315 = arith.mulf %314, %257 : vector<8x32xf32>
    %316 = vector.extract_strided_slice %311 {offsets = [0, 0], sizes = [8, 32], strides = [1, 1]} : vector<8x96xf32> to vector<8x32xf32>
    %317 = arith.mulf %316, %313 : vector<8x32xf32>
    %318 = arith.addf %315, %317 : vector<8x32xf32>
    %319 = vector.extract_strided_slice %311 {offsets = [0, 64], sizes = [8, 32], strides = [1, 1]} : vector<8x96xf32> to vector<8x32xf32>
    %320 = math.tanh %318 : vector<8x32xf32>
    %321 = arith.mulf %319, %320 : vector<8x32xf32>
    %cst_40 = arith.constant dense<0.000000e+00> : vector<8x256xf32>
    %322 = tpu.matmul %321, %2, %cst_40 {dimension_numbers = #tpu.dot_dimension_numbers<[1], [0], [0], [1], [0, 0, 1, 1], [], []>} : vector<8x32xf32>, vector<32x256xf32>, vector<8x256xf32> -> vector<8x256xf32>
    %323 = vector.extract_strided_slice %322 {offsets = [0, 0], sizes = [8, 128], strides = [1, 1]} : vector<8x256xf32> to vector<8x128xf32>
    %324 = vector.extract_strided_slice %322 {offsets = [0, 128], sizes = [8, 128], strides = [1, 1]} : vector<8x256xf32> to vector<8x128xf32>
    %325 = arith.addf %324, %6 : vector<8x128xf32>
    %326 = arith.addf %303, %282 : vector<8x128xf32>
    %327 = vector.extract_strided_slice %326 {offsets = [0, 0], sizes = [8, 96], strides = [1, 1]} : vector<8x128xf32> to vector<8x96xf32>
    %328 = arith.negf %327 : vector<8x96xf32>
    %329 = math.exp %328 : vector<8x96xf32>
    %cst_41 = arith.constant 1.000000e+00 : f32
    %330 = vector.broadcast %cst_41 : f32 to vector<8x96xf32>
    %331 = arith.addf %330, %329 : vector<8x96xf32>
    %332 = arith.divf %330, %331 : vector<8x96xf32>
    %333 = vector.extract_strided_slice %326 {offsets = [0, 96], sizes = [8, 32], strides = [1, 1]} : vector<8x128xf32> to vector<8x32xf32>
    %334 = math.tanh %333 : vector<8x32xf32>
    %335 = vector.extract_strided_slice %332 {offsets = [0, 32], sizes = [8, 32], strides = [1, 1]} : vector<8x96xf32> to vector<8x32xf32>
    %336 = arith.mulf %335, %278 : vector<8x32xf32>
    %337 = vector.extract_strided_slice %332 {offsets = [0, 0], sizes = [8, 32], strides = [1, 1]} : vector<8x96xf32> to vector<8x32xf32>
    %338 = arith.mulf %337, %334 : vector<8x32xf32>
    %339 = arith.addf %336, %338 : vector<8x32xf32>
    %340 = vector.extract_strided_slice %332 {offsets = [0, 64], sizes = [8, 32], strides = [1, 1]} : vector<8x96xf32> to vector<8x32xf32>
    %341 = math.tanh %339 : vector<8x32xf32>
    %342 = arith.mulf %340, %341 : vector<8x32xf32>
    %cst_42 = arith.constant dense<0.000000e+00> : vector<8x128xf32>
    %343 = tpu.matmul %342, %10, %cst_42 {dimension_numbers = #tpu.dot_dimension_numbers<[1], [0], [0], [1], [0, 0, 1, 1], [], []>} : vector<8x32xf32>, vector<32x128xf32>, vector<8x128xf32> -> vector<8x128xf32>
    %344 = arith.addf %325, %301 : vector<8x128xf32>
    %345 = vector.extract_strided_slice %344 {offsets = [0, 0], sizes = [8, 96], strides = [1, 1]} : vector<8x128xf32> to vector<8x96xf32>
    %346 = arith.negf %345 : vector<8x96xf32>
    %347 = math.exp %346 : vector<8x96xf32>
    %cst_43 = arith.constant 1.000000e+00 : f32
    %348 = vector.broadcast %cst_43 : f32 to vector<8x96xf32>
    %349 = arith.addf %348, %347 : vector<8x96xf32>
    %350 = arith.divf %348, %349 : vector<8x96xf32>
    %351 = vector.extract_strided_slice %344 {offsets = [0, 96], sizes = [8, 32], strides = [1, 1]} : vector<8x128xf32> to vector<8x32xf32>
    %352 = math.tanh %351 : vector<8x32xf32>
    %353 = vector.extract_strided_slice %350 {offsets = [0, 32], sizes = [8, 32], strides = [1, 1]} : vector<8x96xf32> to vector<8x32xf32>
    %354 = arith.mulf %353, %296 : vector<8x32xf32>
    %355 = vector.extract_strided_slice %350 {offsets = [0, 0], sizes = [8, 32], strides = [1, 1]} : vector<8x96xf32> to vector<8x32xf32>
    %356 = arith.mulf %355, %352 : vector<8x32xf32>
    %357 = arith.addf %354, %356 : vector<8x32xf32>
    %358 = vector.extract_strided_slice %350 {offsets = [0, 64], sizes = [8, 32], strides = [1, 1]} : vector<8x96xf32> to vector<8x32xf32>
    %359 = math.tanh %357 : vector<8x32xf32>
    %360 = arith.mulf %358, %359 : vector<8x32xf32>
    %cst_44 = arith.constant dense<0.000000e+00> : vector<8x256xf32>
    %361 = tpu.matmul %360, %3, %cst_44 {dimension_numbers = #tpu.dot_dimension_numbers<[1], [0], [0], [1], [0, 0, 1, 1], [], []>} : vector<8x32xf32>, vector<32x256xf32>, vector<8x256xf32> -> vector<8x256xf32>
    %362 = vector.extract_strided_slice %361 {offsets = [0, 0], sizes = [8, 128], strides = [1, 1]} : vector<8x256xf32> to vector<8x128xf32>
    %363 = vector.extract_strided_slice %361 {offsets = [0, 128], sizes = [8, 128], strides = [1, 1]} : vector<8x256xf32> to vector<8x128xf32>
    %364 = arith.addf %363, %9 : vector<8x128xf32>
    %365 = vector.extract_strided_slice %14 {offsets = [48, 0], sizes = [8, 128], strides = [1, 1]} : vector<64x128xf32> to vector<8x128xf32>
    %366 = arith.addf %365, %323 : vector<8x128xf32>
    %367 = vector.extract_strided_slice %366 {offsets = [0, 0], sizes = [8, 96], strides = [1, 1]} : vector<8x128xf32> to vector<8x96xf32>
    %368 = arith.negf %367 : vector<8x96xf32>
    %369 = math.exp %368 : vector<8x96xf32>
    %cst_45 = arith.constant 1.000000e+00 : f32
    %370 = vector.broadcast %cst_45 : f32 to vector<8x96xf32>
    %371 = arith.addf %370, %369 : vector<8x96xf32>
    %372 = arith.divf %370, %371 : vector<8x96xf32>
    %373 = vector.extract_strided_slice %366 {offsets = [0, 96], sizes = [8, 32], strides = [1, 1]} : vector<8x128xf32> to vector<8x32xf32>
    %374 = math.tanh %373 : vector<8x32xf32>
    %375 = vector.extract_strided_slice %372 {offsets = [0, 32], sizes = [8, 32], strides = [1, 1]} : vector<8x96xf32> to vector<8x32xf32>
    %376 = arith.mulf %375, %318 : vector<8x32xf32>
    %377 = vector.extract_strided_slice %372 {offsets = [0, 0], sizes = [8, 32], strides = [1, 1]} : vector<8x96xf32> to vector<8x32xf32>
    %378 = arith.mulf %377, %374 : vector<8x32xf32>
    %379 = arith.addf %376, %378 : vector<8x32xf32>
    %380 = vector.extract_strided_slice %372 {offsets = [0, 64], sizes = [8, 32], strides = [1, 1]} : vector<8x96xf32> to vector<8x32xf32>
    %381 = math.tanh %379 : vector<8x32xf32>
    %382 = arith.mulf %380, %381 : vector<8x32xf32>
    %cst_46 = arith.constant dense<0.000000e+00> : vector<8x256xf32>
    %383 = tpu.matmul %382, %2, %cst_46 {dimension_numbers = #tpu.dot_dimension_numbers<[1], [0], [0], [1], [0, 0, 1, 1], [], []>} : vector<8x32xf32>, vector<32x256xf32>, vector<8x256xf32> -> vector<8x256xf32>
    %384 = vector.extract_strided_slice %383 {offsets = [0, 0], sizes = [8, 128], strides = [1, 1]} : vector<8x256xf32> to vector<8x128xf32>
    %385 = vector.extract_strided_slice %383 {offsets = [0, 128], sizes = [8, 128], strides = [1, 1]} : vector<8x256xf32> to vector<8x128xf32>
    %386 = arith.addf %385, %6 : vector<8x128xf32>
    %387 = arith.addf %364, %343 : vector<8x128xf32>
    %388 = vector.extract_strided_slice %387 {offsets = [0, 0], sizes = [8, 96], strides = [1, 1]} : vector<8x128xf32> to vector<8x96xf32>
    %389 = arith.negf %388 : vector<8x96xf32>
    %390 = math.exp %389 : vector<8x96xf32>
    %cst_47 = arith.constant 1.000000e+00 : f32
    %391 = vector.broadcast %cst_47 : f32 to vector<8x96xf32>
    %392 = arith.addf %391, %390 : vector<8x96xf32>
    %393 = arith.divf %391, %392 : vector<8x96xf32>
    %394 = vector.extract_strided_slice %387 {offsets = [0, 96], sizes = [8, 32], strides = [1, 1]} : vector<8x128xf32> to vector<8x32xf32>
    %395 = math.tanh %394 : vector<8x32xf32>
    %396 = vector.extract_strided_slice %393 {offsets = [0, 32], sizes = [8, 32], strides = [1, 1]} : vector<8x96xf32> to vector<8x32xf32>
    %397 = arith.mulf %396, %339 : vector<8x32xf32>
    %398 = vector.extract_strided_slice %393 {offsets = [0, 0], sizes = [8, 32], strides = [1, 1]} : vector<8x96xf32> to vector<8x32xf32>
    %399 = arith.mulf %398, %395 : vector<8x32xf32>
    %400 = arith.addf %397, %399 : vector<8x32xf32>
    %401 = vector.extract_strided_slice %393 {offsets = [0, 64], sizes = [8, 32], strides = [1, 1]} : vector<8x96xf32> to vector<8x32xf32>
    %402 = math.tanh %400 : vector<8x32xf32>
    %403 = arith.mulf %401, %402 : vector<8x32xf32>
    %cst_48 = arith.constant dense<0.000000e+00> : vector<8x128xf32>
    %404 = tpu.matmul %403, %10, %cst_48 {dimension_numbers = #tpu.dot_dimension_numbers<[1], [0], [0], [1], [0, 0, 1, 1], [], []>} : vector<8x32xf32>, vector<32x128xf32>, vector<8x128xf32> -> vector<8x128xf32>
    %405 = arith.addf %386, %362 : vector<8x128xf32>
    %406 = vector.extract_strided_slice %405 {offsets = [0, 0], sizes = [8, 96], strides = [1, 1]} : vector<8x128xf32> to vector<8x96xf32>
    %407 = arith.negf %406 : vector<8x96xf32>
    %408 = math.exp %407 : vector<8x96xf32>
    %cst_49 = arith.constant 1.000000e+00 : f32
    %409 = vector.broadcast %cst_49 : f32 to vector<8x96xf32>
    %410 = arith.addf %409, %408 : vector<8x96xf32>
    %411 = arith.divf %409, %410 : vector<8x96xf32>
    %412 = vector.extract_strided_slice %405 {offsets = [0, 96], sizes = [8, 32], strides = [1, 1]} : vector<8x128xf32> to vector<8x32xf32>
    %413 = math.tanh %412 : vector<8x32xf32>
    %414 = vector.extract_strided_slice %411 {offsets = [0, 32], sizes = [8, 32], strides = [1, 1]} : vector<8x96xf32> to vector<8x32xf32>
    %415 = arith.mulf %414, %357 : vector<8x32xf32>
    %416 = vector.extract_strided_slice %411 {offsets = [0, 0], sizes = [8, 32], strides = [1, 1]} : vector<8x96xf32> to vector<8x32xf32>
    %417 = arith.mulf %416, %413 : vector<8x32xf32>
    %418 = arith.addf %415, %417 : vector<8x32xf32>
    %419 = vector.extract_strided_slice %411 {offsets = [0, 64], sizes = [8, 32], strides = [1, 1]} : vector<8x96xf32> to vector<8x32xf32>
    %420 = math.tanh %418 : vector<8x32xf32>
    %421 = arith.mulf %419, %420 : vector<8x32xf32>
    %cst_50 = arith.constant dense<0.000000e+00> : vector<8x256xf32>
    %422 = tpu.matmul %421, %3, %cst_50 {dimension_numbers = #tpu.dot_dimension_numbers<[1], [0], [0], [1], [0, 0, 1, 1], [], []>} : vector<8x32xf32>, vector<32x256xf32>, vector<8x256xf32> -> vector<8x256xf32>
    %423 = vector.extract_strided_slice %422 {offsets = [0, 0], sizes = [8, 128], strides = [1, 1]} : vector<8x256xf32> to vector<8x128xf32>
    %424 = vector.extract_strided_slice %422 {offsets = [0, 128], sizes = [8, 128], strides = [1, 1]} : vector<8x256xf32> to vector<8x128xf32>
    %425 = arith.addf %424, %9 : vector<8x128xf32>
    %426 = vector.extract_strided_slice %14 {offsets = [56, 0], sizes = [8, 128], strides = [1, 1]} : vector<64x128xf32> to vector<8x128xf32>
    %427 = arith.addf %426, %384 : vector<8x128xf32>
    %428 = vector.extract_strided_slice %427 {offsets = [0, 0], sizes = [8, 96], strides = [1, 1]} : vector<8x128xf32> to vector<8x96xf32>
    %429 = arith.negf %428 : vector<8x96xf32>
    %430 = math.exp %429 : vector<8x96xf32>
    %cst_51 = arith.constant 1.000000e+00 : f32
    %431 = vector.broadcast %cst_51 : f32 to vector<8x96xf32>
    %432 = arith.addf %431, %430 : vector<8x96xf32>
    %433 = arith.divf %431, %432 : vector<8x96xf32>
    %434 = vector.extract_strided_slice %427 {offsets = [0, 96], sizes = [8, 32], strides = [1, 1]} : vector<8x128xf32> to vector<8x32xf32>
    %435 = math.tanh %434 : vector<8x32xf32>
    %436 = vector.extract_strided_slice %433 {offsets = [0, 32], sizes = [8, 32], strides = [1, 1]} : vector<8x96xf32> to vector<8x32xf32>
    %437 = arith.mulf %436, %379 : vector<8x32xf32>
    %438 = vector.extract_strided_slice %433 {offsets = [0, 0], sizes = [8, 32], strides = [1, 1]} : vector<8x96xf32> to vector<8x32xf32>
    %439 = arith.mulf %438, %435 : vector<8x32xf32>
    %440 = arith.addf %437, %439 : vector<8x32xf32>
    %441 = vector.extract_strided_slice %433 {offsets = [0, 64], sizes = [8, 32], strides = [1, 1]} : vector<8x96xf32> to vector<8x32xf32>
    %442 = math.tanh %440 : vector<8x32xf32>
    %443 = arith.mulf %441, %442 : vector<8x32xf32>
    %cst_52 = arith.constant dense<0.000000e+00> : vector<8x256xf32>
    %444 = tpu.matmul %443, %2, %cst_52 {dimension_numbers = #tpu.dot_dimension_numbers<[1], [0], [0], [1], [0, 0, 1, 1], [], []>} : vector<8x32xf32>, vector<32x256xf32>, vector<8x256xf32> -> vector<8x256xf32>
    %445 = vector.extract_strided_slice %444 {offsets = [0, 128], sizes = [8, 128], strides = [1, 1]} : vector<8x256xf32> to vector<8x128xf32>
    %446 = arith.addf %445, %6 : vector<8x128xf32>
    %447 = arith.addf %425, %404 : vector<8x128xf32>
    %448 = vector.extract_strided_slice %447 {offsets = [0, 0], sizes = [8, 96], strides = [1, 1]} : vector<8x128xf32> to vector<8x96xf32>
    %449 = arith.negf %448 : vector<8x96xf32>
    %450 = math.exp %449 : vector<8x96xf32>
    %cst_53 = arith.constant 1.000000e+00 : f32
    %451 = vector.broadcast %cst_53 : f32 to vector<8x96xf32>
    %452 = arith.addf %451, %450 : vector<8x96xf32>
    %453 = arith.divf %451, %452 : vector<8x96xf32>
    %454 = vector.extract_strided_slice %447 {offsets = [0, 96], sizes = [8, 32], strides = [1, 1]} : vector<8x128xf32> to vector<8x32xf32>
    %455 = math.tanh %454 : vector<8x32xf32>
    %456 = vector.extract_strided_slice %453 {offsets = [0, 32], sizes = [8, 32], strides = [1, 1]} : vector<8x96xf32> to vector<8x32xf32>
    %457 = arith.mulf %456, %400 : vector<8x32xf32>
    %458 = vector.extract_strided_slice %453 {offsets = [0, 0], sizes = [8, 32], strides = [1, 1]} : vector<8x96xf32> to vector<8x32xf32>
    %459 = arith.mulf %458, %455 : vector<8x32xf32>
    %460 = arith.addf %457, %459 : vector<8x32xf32>
    %461 = vector.extract_strided_slice %453 {offsets = [0, 64], sizes = [8, 32], strides = [1, 1]} : vector<8x96xf32> to vector<8x32xf32>
    %462 = math.tanh %460 : vector<8x32xf32>
    %463 = arith.mulf %461, %462 : vector<8x32xf32>
    %cst_54 = arith.constant dense<0.000000e+00> : vector<8x128xf32>
    %464 = tpu.matmul %463, %10, %cst_54 {dimension_numbers = #tpu.dot_dimension_numbers<[1], [0], [0], [1], [0, 0, 1, 1], [], []>} : vector<8x32xf32>, vector<32x128xf32>, vector<8x128xf32> -> vector<8x128xf32>
    %465 = arith.addf %446, %423 : vector<8x128xf32>
    %466 = vector.extract_strided_slice %465 {offsets = [0, 0], sizes = [8, 96], strides = [1, 1]} : vector<8x128xf32> to vector<8x96xf32>
    %467 = arith.negf %466 : vector<8x96xf32>
    %468 = math.exp %467 : vector<8x96xf32>
    %cst_55 = arith.constant 1.000000e+00 : f32
    %469 = vector.broadcast %cst_55 : f32 to vector<8x96xf32>
    %470 = arith.addf %469, %468 : vector<8x96xf32>
    %471 = arith.divf %469, %470 : vector<8x96xf32>
    %472 = vector.extract_strided_slice %465 {offsets = [0, 96], sizes = [8, 32], strides = [1, 1]} : vector<8x128xf32> to vector<8x32xf32>
    %473 = math.tanh %472 : vector<8x32xf32>
    %474 = vector.extract_strided_slice %471 {offsets = [0, 32], sizes = [8, 32], strides = [1, 1]} : vector<8x96xf32> to vector<8x32xf32>
    %475 = arith.mulf %474, %418 : vector<8x32xf32>
    %476 = vector.extract_strided_slice %471 {offsets = [0, 0], sizes = [8, 32], strides = [1, 1]} : vector<8x96xf32> to vector<8x32xf32>
    %477 = arith.mulf %476, %473 : vector<8x32xf32>
    %478 = arith.addf %475, %477 : vector<8x32xf32>
    %479 = vector.extract_strided_slice %471 {offsets = [0, 64], sizes = [8, 32], strides = [1, 1]} : vector<8x96xf32> to vector<8x32xf32>
    %480 = math.tanh %478 : vector<8x32xf32>
    %481 = arith.mulf %479, %480 : vector<8x32xf32>
    %cst_56 = arith.constant dense<0.000000e+00> : vector<8x256xf32>
    %482 = tpu.matmul %481, %3, %cst_56 {dimension_numbers = #tpu.dot_dimension_numbers<[1], [0], [0], [1], [0, 0, 1, 1], [], []>} : vector<8x32xf32>, vector<32x256xf32>, vector<8x256xf32> -> vector<8x256xf32>
    %483 = vector.extract_strided_slice %482 {offsets = [0, 128], sizes = [8, 128], strides = [1, 1]} : vector<8x256xf32> to vector<8x128xf32>
    %484 = arith.addf %483, %9 : vector<8x128xf32>
    %485 = arith.addf %484, %464 : vector<8x128xf32>
    %486 = vector.extract_strided_slice %485 {offsets = [0, 0], sizes = [8, 96], strides = [1, 1]} : vector<8x128xf32> to vector<8x96xf32>
    %487 = arith.negf %486 : vector<8x96xf32>
    %488 = math.exp %487 : vector<8x96xf32>
    %cst_57 = arith.constant 1.000000e+00 : f32
    %489 = vector.broadcast %cst_57 : f32 to vector<8x96xf32>
    %490 = arith.addf %489, %488 : vector<8x96xf32>
    %491 = arith.divf %489, %490 : vector<8x96xf32>
    %492 = vector.extract_strided_slice %485 {offsets = [0, 96], sizes = [8, 32], strides = [1, 1]} : vector<8x128xf32> to vector<8x32xf32>
    %493 = math.tanh %492 : vector<8x32xf32>
    %494 = vector.extract_strided_slice %491 {offsets = [0, 32], sizes = [8, 32], strides = [1, 1]} : vector<8x96xf32> to vector<8x32xf32>
    %495 = arith.mulf %494, %460 : vector<8x32xf32>
    %496 = vector.extract_strided_slice %491 {offsets = [0, 0], sizes = [8, 32], strides = [1, 1]} : vector<8x96xf32> to vector<8x32xf32>
    %497 = arith.mulf %496, %493 : vector<8x32xf32>
    %498 = arith.addf %495, %497 : vector<8x32xf32>
    %499 = vector.extract_strided_slice %491 {offsets = [0, 64], sizes = [8, 32], strides = [1, 1]} : vector<8x96xf32> to vector<8x32xf32>
    %500 = math.tanh %498 : vector<8x32xf32>
    %501 = arith.mulf %499, %500 : vector<8x32xf32>
    %c160 = arith.constant 160 : index
    %c0_58 = arith.constant 0 : index
    %502 = vector.load %arg1[%c160, %c0_58] : memref<200x256xf32, #tpu.memory_space<vmem>>, vector<32x16xf32>
    %c192 = arith.constant 192 : index
    %c0_59 = arith.constant 0 : index
    %503 = vector.load %arg1[%c192, %c0_59] : memref<200x256xf32, #tpu.memory_space<vmem>>, vector<1x16xf32>
    %cst_60 = arith.constant dense<0.000000e+00> : vector<8x16xf32>
    %504 = tpu.matmul %501, %502, %cst_60 {dimension_numbers = #tpu.dot_dimension_numbers<[1], [0], [0], [1], [0, 0, 1, 1], [], []>} : vector<8x32xf32>, vector<32x16xf32>, vector<8x16xf32> -> vector<8x16xf32>
    %505 = vector.broadcast %503 : vector<1x16xf32> to vector<8x16xf32>
    %506 = arith.addf %504, %505 : vector<8x16xf32>
    %507 = arith.mulf %506, %506 : vector<8x16xf32>
    %cst_61 = arith.constant dense<0.000000e+00> : vector<8xf32>
    %508 = vector.multi_reduction <add>, %507, %cst_61 [1] : vector<8x16xf32> to vector<8xf32>
    %509 = vector.shape_cast %508 : vector<8xf32> to vector<8x1xf32>
    %cst_62 = arith.constant 9.99999996E-13 : f32
    %510 = vector.broadcast %cst_62 : f32 to vector<8x1xf32>
    %511 = arith.addf %509, %510 : vector<8x1xf32>
    %512 = math.rsqrt %511 : vector<8x1xf32>
    %513 = vector.broadcast %512 : vector<8x1xf32> to vector<8x16xf32>
    %514 = arith.mulf %506, %513 : vector<8x16xf32>
    %515 = vector.extract_strided_slice %514 {offsets = [0, 0], sizes = [2, 16], strides = [1, 1]} : vector<8x16xf32> to vector<2x16xf32>
    %c0_63 = arith.constant 0 : index
    %c0_64 = arith.constant 0 : index
    %516 = vector.load %arg2[%c0_63, %c0_64] : memref<2x16xf32, #tpu.memory_space<vmem>>, vector<2x16xf32>
    tpu.vector_store %arg2[%c0_63, %c0_64], %515 {strides = array<i32>} : memref<2x16xf32, #tpu.memory_space<vmem>>, vector<2x16xf32>,
    return
  }
}

</mosaic_0001>

<bundles_post_ra>
// kernel: speech_embedder_pallas.1
= control target key start
LH: loop header
LB: loop body
LE: loop exit
PB: predicated region body
PF: predicated region fallthrough
CT: control target
= control target key end

     0   :  { %7 = vsyncpa [#allocation3], 0  ;;  %s3779_s0 = inlined_call_operand.vmem [shape: f32[64,40], index: 0, kind: input, shape index: {}]   ;;  %s3780_s1 = inlined_call_operand.hbm [shape: f32[200,256], index: 1, kind: input, shape index: {}]   ;;  %s3781_s2 = inlined_call_operand.hbm [shape: f32[2,16], index: 2, kind: output, shape index: {}]  }
   0x1   :  { %8 = vsyncpa [#allocation4], 0  ;;  %s3310_s9 = smov [#allocation2]   ;;  %s3262_s13 = scalar_lea.hbm %s3780_s1, 6400 }
   0x2   :  { %s16_s10 = sshll.u32 %s3310_s9, 4  ;;  %p3263_p0 = scmp.ne.s32.totalorder %s3780_s1, %s3262_s13  ;;  %s17_s10 = int_to_ptr.vmem [resolvable:$true] %s16_s10 }
   0x3   :  { %p3266_p1 = scmp.lt.u32.totalorder %s3262_s13, %s3780_s1 }
   0x5   :  { %p3268_p2 = pnand %p3266_p1, %p3263_p0 }
   0x7   :  { %3271 = shalt.err (!%p3268_p2)
}
   0x8   :  { %s3272_s18 = scalar_lea.vmem %s17_s10, 6400  ;;  %p3277_p4 = scmp.lt.s32.totalorder %s17_s10, %s17_s10 }
   0x9   :  { %p3273_p3 = scmp.ne.s32.totalorder %s17_s10, %s3272_s18  ;;  %p3278_p5 = scmp.lt.s32.totalorder %s3272_s18, %s3272_s18 }
   0xb   :  { %p3279_p6 = por %p3278_p5, %p3277_p4 }
   0xd   :  { %p3280_p7 = pnand %p3279_p6, %p3273_p3 }
   0xf   :  { %3283 = shalt.err (!%p3280_p7)
}
  0x10   :  { %s3311_s19 = smov 256   ;;  %s3312_s20 = smov 16  }
  0x11   :  { %22 = dma.hbm_to_vmem [thread:$0]  %s3780_s1, 6400, %s17_s10, [#allocation3], %s3311_s19, %s3311_s19, %s3312_s20  }
  0x12   :  { %3306 = dma.done.wait [#allocation3], 6400  }
  0x13   :  { %3307 = vsyncadd [#allocation3], 4294960896  ;;  %vm62_vm0 = vcmask 326656   ;;  %v26_v0 = vld [vmem:[#allocation2] sm:$0xff]  ;;  %v27_v1 = vld [vmem:[#allocation2 + $0x10] sm:$0xff]  ;;  %s3313_s26 = smov 32  }
  0x14   :  { %v28_v2 = vld [vmem:[#allocation2 + $0x20] sm:$0xff]  ;;  %v2872_v3 = vpack.c.bf16 %v27_v1, %v26_v0  ;;  %v29_v4 = vld [vmem:[#allocation2 + $0x30] sm:$0xff]  ;;  %v55_v8 = vld [vmem:[%s3779_s0 + $0x8] sm:$0xff]  ;;  %v3314_v30 = vmov 0.0   ;;  %s3315_s27 = smov 64   ;;  %vm220_vm1 = vcmask 261120  }
  0x15   :  { %v54_v5 = vld [vmem:[%s3779_s0] sm:$0xff]  ;;  %v2876_v6 = vpack.c.bf16 %v29_v4, %v28_v2  ;;  %v3354_v9 = vld [vmem:[#allocation2 + $0x50] ss:$0 sm:$0xff]  ;;  %v33_v23 = vld [vmem:[#allocation2 + $0x68] sm:$0xff]  ;;  %287 = vmatprep.mubr.f32.mxu1 %v3314_v30  ;;  %vm3317_vm2 = vmmov 0   ;;  %vm2629_vm3 = vcmask 130048  }
  0x16   :  { %2772 = vmatprep.mubr.msk.f32.mxu0 %vm62_vm0, %v54_v5  ;;  %2873 = vmatprep.subr.bf16.mxu0 %v2872_v3  ;;  %v30_v7 = vld [vmem:[#allocation2 + $0x40] sm:$0xff]  ;;  %v35_v24 = vld [vmem:[#allocation2 + $0x78] sm:$0xff]  ;;  %v34_v27 = vld [vmem:[#allocation2 + $0x70] sm:$0xff]  ;;  %vm2636_vm4 = vcmask 123904  }
  0x17   :  { %2875 = vmatpush3.bf16.msra.mxu0 %v2872_v3  ;;  %v32_v25 = vld [vmem:[#allocation2 + $0x60] sm:$0xff]  ;;  %v3359_v26 = vpack.c.bf16 %v35_v24, %v33_v23  ;;  %v37_v28 = vld [vmem:[#allocation2 + $0x88] sm:$0xff]  ;;  %v39_v29 = vld [vmem:[#allocation2 + $0x98] sm:$0xff] }
  0x18   :  { %2877 = vmatprep.subr.bf16.mxu0 %v2876_v6  ;;  %v3362_v31 = vpack.c.bf16 %v34_v27, %v32_v25  ;;  %v3364_v32 = vpack.c.bf16 %v39_v29, %v37_v28  ;;  %v36_v33 = vld [vmem:[#allocation2 + $0x80] sm:$0xff]  ;;  %v38_v34 = vld [vmem:[#allocation2 + $0x90] sm:$0xff]  ;;  %v41_v2 = vld [vmem:[#allocation2 + $0xb8] sm:$0xff] }
  0x19   :  { %2881 = vmatprep.subr.bf16.mxu1 %v3359_v26  ;;  %v3368_v35 = vpack.c.bf16 %v38_v34, %v36_v33  ;;  %v3377_v41 = vld [vmem:[#allocation2 + $0xa0] ss:$0 sm:$0xff]  ;;  %v43_v3 = vld [vmem:[#allocation2 + $0xc8] sm:$0xff]  ;;  %v40_v4 = vld [vmem:[#allocation2 + $0xb0] sm:$0xff] }
  0x1a   :  { %2883 = vmatpush1.bf16.msra.mxu1 %v3362_v31  ;;  %v3390_v5 = vpack.c.bf16 %v43_v3, %v41_v2  ;;  %v3428_v28 = vld [vmem:[#allocation2 + $0xf0] ss:$0 sm:$0xff] }
  0x1b   :  { %2879 = vmatpush3.bf16.msra.mxu0 %v2876_v6  ;;  %2885 = vmatprep.subr.bf16.mxu1 %v3364_v32  ;;  %v42_v6 = vld [vmem:[#allocation2 + $0xc0] sm:$0xff] }
  0x1c   :  { %2770 = vmatprep.subr.mxu0 %v30_v7 }
  0x1e   :  { %2887 = vmatpush1.bf16.msra.mxu1 %v3368_v35 }
  0x1f   :  { %2771 = vmatpush3.msra.mxu0 %v30_v7  ;;  %v45_v7 = vld [vmem:[#allocation2 + $0xd8] sm:$0xff]  ;;  %2889 = vmatprep.subr.bf16.mxu1 %v3390_v5 }
  0x20   :  { %2773 = vmatmul.mubr.msk.f32.vlgmr.msra.gmra.mrb[0].mxu0 %vm62_vm0, %v55_v8  ;;  %v47_v8 = vld [vmem:[#allocation2 + $0xe8] sm:$0xff] }
  0xf3   :  { %v2774_v10 = vpop.f32.mrb[0].mxu0 }
  0xf4   :  { %v153_v11 = vpop.f32.mrb[1].mxu0  ;;  %v159_v40 = vadd.f32 %v2774_v10, %v3354_v9  ;;  %v3392_v10 = vpack.c.bf16 %v42_v6, %v40_v4 }
  0xf5   :  { %v154_v12 = vadd.f32 %v153_v11, %v3354_v9  ;;  %v3394_v11 = vpack.c.bf16 %v47_v8, %v45_v7 }
  0xf7   :  { %3065 = vtanh.f32 %v154_v12  ;;  %v2661_v14 = vmul.f32 -1.442695, %v154_v12  ;;  %v44_v12 = vld [vmem:[#allocation2 + $0xd0] sm:$0xff] }
  0xf9   :  { %3067 = vpow2.f32 %v2661_v14 }
 0x101   :  { %v3066_v13 = vpop.eup %3065 }
 0x102   :  { %202 = vrot.lane.b32.xlu0 %v3066_v13, %s3313_s26  ;;  %v46_v13 = vld [vmem:[#allocation2 + $0xe0] sm:$0xff] }
 0x103   :  { %v3068_v15 = vpop.eup %3067  ;;  %v3398_v14 = vpack.c.bf16 %v46_v13, %v44_v12 }
 0x104   :  { %v196_v16 = vadd.f32 1.0, %v3068_v15 }
 0x106   :  { %3069 = vrcp.f32 %v196_v16 }
 0x110   :  { %v3070_v17 = vpop.eup %3069 }
 0x111   :  { %v200_v20 = vmul.f32 0.0, %v3070_v17 }
 0x174   :  { %v203_v18 = vpop.permute.xlu0 %202 }
 0x175   :  { %v205_v19 = vmul.f32 %v3070_v17, %v203_v18  ;;  %v57_v18 = vld [vmem:[%s3779_s0 + $0x18] sm:$0xff] }
 0x177   :  { %207 = vrot.lane.b32.xlu0 %v205_v19, %s3313_s26 }
 0x1e9   :  { %v208_v21 = vpop.permute.xlu0 %207 }
 0x1ea   :  { %v210_v22 = vadd.f32 %v208_v21, %v200_v20 }
 0x1ec   :  { %3071 = vtanh.f32 %v210_v22 }
 0x1f6   :  { %v3072_v36 = vpop.eup %3071 }
 0x1f7   :  { %213 = vrot.lane.b32.xlu1 %v3072_v36, %s3313_s26 }
 0x269   :  { %v214_v37 = vpop.permute.xlu1 %213 }
 0x26a   :  { %v216_v38 = vmul.f32 %v3070_v17, %v214_v37  ;;  %v56_v17 = vld [vmem:[%s3779_s0 + $0x10] sm:$0xff] }
 0x26b   :  { %2775 = vmatprep.mubr.msk.f32.mxu0 %vm62_vm0, %v56_v17  ;;  %v58_v17 = vld [vmem:[%s3779_s0 + $0x20] sm:$0xff] }
 0x26c   :  { %218 = vrot.lane.b32.xlu1 %v216_v38, %s3315_s27  ;;  %2776 = vmatmul.mubr.msk.f32.gmra.mrb[2].mxu0 %vm62_vm0, %v57_v18  ;;  %v50_v18 = vld [vmem:[#allocation2 + $0x100] sm:$0xff] }
 0x26d   :  { %2778 = vmatprep.mubr.msk.f32.mxu0 %vm62_vm0, %v58_v17 }
 0x2de   :  { %v219_v39 = vpop.permute.xlu1 %218 }
 0x2df   :  { %2662 = vmatmul.mubr.msk.f32.vlgmr.msra.gmra.mrb[0].mxu1 %vm220_vm1, %v219_v39 }
 0x2e0   :  { %389 = vmatprep.mubr.f32.mxu1 %v3314_v30  ;;  %2891 = vmatpush1.bf16.msra.mxu1 %v3392_v10 }
 0x2e1   :  { %2893 = vmatprep.subr.bf16.mxu1 %v3394_v11 }
 0x2e4   :  { %2895 = vmatpush1.bf16.msra.mxu1 %v3398_v14 }
 0x2e5   :  { %2897 = vmatprep.subr.bf16.mxu1 %v3359_v26 }
 0x33f   :  { %v3426_v25 = vpop.f32.mrb[2].mxu0 }
 0x340   :  { %v163_v27 = vpop.f32.mrb[3].mxu0 }
 0x341   :  { %v164_v36 = vadd.f32 %v163_v27, %v3354_v9 }
 0x3b2   :  { %v289_v42 = vpop.f32.mrb[0].mxu1 }
 0x3b3   :  { %v397_v43 = vadd.f32 %v289_v42, %v159_v40  ;;  %v291_v44 = vpop.f32.mrb[1].mxu1 }
 0x3b4   :  { %v294_v45 = vadd.f32 %v291_v44, %v3377_v41 }
 0x3b5   :  { %3073 = vtanh.f32 %v397_v43  ;;  %v2665_v48 = vmul.f32 -1.442695, %v397_v43 }
 0x3b6   :  { %3075 = vtanh.f32 %v294_v45  ;;  %v2663_v49 = vmul.f32 -1.442695, %v294_v45 }
 0x3b7   :  { %3077 = vpow2.f32 %v2665_v48 }
 0x3b8   :  { %3079 = vpow2.f32 %v2663_v49 }
 0x3bf   :  { %v3074_v46 = vpop.eup %3073 }
 0x3c0   :  { %v3076_v47 = vpop.eup %3075  ;;  %407 = vrot.lane.b32.xlu1 %v3074_v46, %s3313_s26 }
 0x3c1   :  { %305 = vrot.lane.b32.xlu0 %v3076_v47, %s3313_s26  ;;  %v3078_v50 = vpop.eup %3077 }
 0x3c2   :  { %v3080_v51 = vpop.eup %3079  ;;  %v401_v52 = vadd.f32 1.0, %v3078_v50 }
 0x3c3   :  { %v299_v53 = vadd.f32 1.0, %v3080_v51 }
 0x3c4   :  { %3081 = vrcp.f32 %v401_v52 }
 0x3c5   :  { %3083 = vrcp.f32 %v299_v53 }
 0x3ce   :  { %v3082_v54 = vpop.eup %3081 }
 0x3cf   :  { %v3084_v56 = vpop.eup %3083  ;;  %v405_v60 = vmul.f32 %v3082_v54, %v210_v22 }
 0x3d0   :  { %v303_v62 = vmul.f32 0.0, %v3084_v56 }
 0x432   :  { %v408_v55 = vpop.permute.xlu1 %407 }
 0x433   :  { %v410_v57 = vmul.f32 %v3082_v54, %v408_v55  ;;  %v306_v58 = vpop.permute.xlu0 %305 }
 0x434   :  { %v308_v59 = vmul.f32 %v3084_v56, %v306_v58 }
 0x435   :  { %412 = vrot.lane.b32.xlu1 %v410_v57, %s3313_s26 }
 0x436   :  { %310 = vrot.lane.b32.xlu0 %v308_v59, %s3313_s26 }
 0x4a7   :  { %v413_v61 = vpop.permute.xlu1 %412 }
 0x4a8   :  { %v3384_v63 = vadd.f32 %v413_v61, %v405_v60  ;;  %v311_v0 = vpop.permute.xlu0 %310 }
 0x4a9   :  { %v3386_v1 = vadd.f32 %v311_v0, %v303_v62 }
 0x4aa   :  { %3085 = vtanh.f32 %v3384_v63 }
 0x4ab   :  { %3087 = vtanh.f32 %v3386_v1 }
 0x4b4   :  { %v3086_v15 = vpop.eup %3085 }
 0x4b5   :  { %v3088_v16 = vpop.eup %3087  ;;  %418 = vrot.lane.b32.xlu1 %v3086_v15, %s3313_s26 }
 0x4b6   :  { %316 = vrot.lane.b32.xlu0 %v3088_v16, %s3313_s26 }
 0x527   :  { %v419_v19 = vpop.permute.xlu1 %418 }
 0x528   :  { %v421_v20 = vmul.f32 %v3082_v54, %v419_v19  ;;  %v317_v21 = vpop.permute.xlu0 %316  ;;  %v3316_v19 = vmov 0.0|0.0  }
 0x529   :  { %v319_v22 = vmul.f32 %v3084_v56, %v317_v21  ;;  %2904 = vmatprep.subr.bf16.mxu0 %v3316_v19 }
 0x52a   :  { %423 = vrot.lane.b32.xlu1 %v421_v20, %s3315_s27  ;;  %v60_v20 = vld [vmem:[%s3779_s0 + $0x30] sm:$0xff] }
 0x52b   :  { %321 = vrot.lane.b32.xlu0 %v319_v22, %s3315_s27  ;;  %v52_v22 = vld [vmem:[#allocation2 + $0x120] sm:$0xff] }
 0x59c   :  { %v424_v24 = vpop.permute.xlu1 %423 }
 0x59d   :  { %v322_v23 = vpop.permute.xlu0 %321 }
 0x59e   :  { %2664 = vmatmul.mubr.msk.f32.vlgmr.msra.gmra.mrb[2].mxu1 %vm220_vm1, %v322_v23  ;;  %v53_v23 = vld [vmem:[#allocation2 + $0x130] sm:$0xff] }
 0x59f   :  { %2899 = vmatpush1.bf16.msra.mxu1 %v3362_v31  ;;  %491 = vmatprep.mubr.f32.mxu1 %v3314_v30  ;;  %v3471_v27 = vpack.c.bf16 %v53_v23, %v52_v22 }
 0x5a0   :  { %2901 = vmatprep.subr.bf16.mxu1 %v3364_v32 }
 0x5a3   :  { %2903 = vmatpush1.bf16.msra.mxu1 %v3368_v35 }
 0x5a4   :  { %2911 = vmatprep.subr.bf16.mxu1 %v3390_v5 }
 0x5a6   :  { %2666 = vmatmul.mubr.msk.f32.vlgmr.msra.gmra.mrb[4].mxu1 %vm220_vm1, %v424_v24  ;;  %v61_v24 = vld [vmem:[%s3779_s0 + $0x38] sm:$0xff] }
 0x5a7   :  { %2913 = vmatpush1.bf16.msra.mxu1 %v3392_v10  ;;  %693 = vmatprep.mubr.f32.mxu1 %v3314_v30 }
 0x5a8   :  { %2915 = vmatprep.subr.bf16.mxu1 %v3394_v11 }
 0x5ab   :  { %2917 = vmatpush1.bf16.msra.mxu1 %v3398_v14 }
 0x5ac   :  { %2926 = vmatprep.subr.bf16.mxu1 %v3316_v19 }
 0x671   :  { %v391_v29 = vpop.f32.mrb[2].mxu1 }
 0x672   :  { %v393_v33 = vpop.f32.mrb[3].mxu1 }
 0x673   :  { %v396_v34 = vadd.f32 %v393_v33, %v3428_v28 }
 0x675   :  { %3089 = vtanh.f32 %v396_v34  ;;  %v2667_v46 = vmul.f32 -1.442695, %v396_v34 }
 0x679   :  { %v493_v37 = vpop.f32.mrb[4].mxu1 }
 0x67a   :  { %v701_v38 = vadd.f32 %v493_v37, %v164_v36  ;;  %v495_v39 = vpop.f32.mrb[5].mxu1 }
 0x67b   :  { %v498_v40 = vadd.f32 %v495_v39, %v3377_v41 }
 0x67c   :  { %v2671_v49 = vmul.f32 -1.442695, %v701_v38 }
 0x67d   :  { %v599_v42 = vadd.f32 %v498_v40, %v391_v29 }
 0x67f   :  { %v3090_v43 = vpop.eup %3089  ;;  %3091 = vtanh.f32 %v599_v42  ;;  %v2669_v47 = vmul.f32 -1.442695, %v599_v42 }
 0x680   :  { %509 = vrot.lane.b32.xlu1 %v3090_v43, %s3313_s26  ;;  %3093 = vtanh.f32 %v701_v38 }
 0x681   :  { %3095 = vpow2.f32 %v2667_v46 }
 0x682   :  { %3097 = vpow2.f32 %v2669_v47 }
 0x683   :  { %3099 = vpow2.f32 %v2671_v49 }
 0x689   :  { %v3092_v44 = vpop.eup %3091 }
 0x68a   :  { %609 = vrot.lane.b32.xlu0 %v3092_v44, %s3313_s26  ;;  %v3094_v45 = vpop.eup %3093 }
 0x68b   :  { %v3096_v48 = vpop.eup %3095 }
 0x68c   :  { %v503_v50 = vadd.f32 1.0, %v3096_v48  ;;  %v3098_v51 = vpop.eup %3097 }
 0x68d   :  { %v603_v52 = vadd.f32 1.0, %v3098_v51  ;;  %v3100_v53 = vpop.eup %3099 }
 0x68e   :  { %711 = vrot.lane.b32.xlu0 %v3094_v45, %s3313_s26  ;;  %3101 = vrcp.f32 %v503_v50  ;;  %v705_v55 = vadd.f32 1.0, %v3100_v53 }
 0x68f   :  { %3103 = vrcp.f32 %v603_v52 }
 0x690   :  { %3105 = vrcp.f32 %v705_v55 }
 0x698   :  { %v3102_v54 = vpop.eup %3101 }
 0x699   :  { %v3104_v58 = vpop.eup %3103  ;;  %v507_v2 = vmul.f32 0.0, %v3102_v54 }
 0x69a   :  { %v3106_v61 = vpop.eup %3105  ;;  %v607_v6 = vmul.f32 %v3104_v58, %v3386_v1  ;;  %v59_v1 = vld [vmem:[%s3779_s0 + $0x28] sm:$0xff]  ;;  %s3318_s0 = smov [#allocation5]  }
 0x69b   :  { %v709_v13 = vmul.f32 %v3106_v61, %v3384_v63  ;;  %v51_v63 = vld [vmem:[#allocation2 + $0x110] sm:$0xff]  ;;  %2779 = vmatmul.mubr.msk.f32.gmra.mrb[4].mxu0 %vm62_vm0, %v59_v1  ;;  %s2644_s12 = sshll.u32 %s3318_s0, 4  ;;  %s2645_s12 = int_to_ptr.vmem [resolvable:$true] %s2644_s12 }
 0x69c   :  { %v3463_v21 = vpack.c.bf16 %v51_v63, %v50_v18  ;;  %2781 = vmatprep.mubr.msk.f32.mxu0 %vm62_vm0, %v60_v20  ;;  %s3284_s13 = scalar_lea.vmem %s2645_s12, 32  ;;  %p3289_p9 = scmp.lt.s32.totalorder %s2645_s12, %s2645_s12 }
 0x69d   :  { %p3285_p8 = scmp.ne.s32.totalorder %s2645_s12, %s3284_s13  ;;  %p3290_p10 = scmp.lt.s32.totalorder %s3284_s13, %s3284_s13 }
 0x69e   :  { %2906 = vmatpush3.bf16.msra.mxu0 %v3463_v21 }
 0x69f   :  { %2907 = vmatprep.subr.bf16.mxu0 %v3316_v19  ;;  %2782 = vmatmul.mubr.msk.f32.gmra.mrb[6].mxu0 %vm62_vm0, %v61_v24  ;;  %p3291_p11 = por %p3290_p10, %p3289_p9 }
 0x6a0   :  { %2792 = vmatprep.mubr.msk.f32.mxu0 %vm3317_vm2, %v3314_v30 }
 0x6a1   :  { %p3292_p12 = pnand %p3291_p11, %p3285_p8 }
 0x6a2   :  { %2909 = vmatpush3.bf16.msra.mxu0 %v3471_v27 }
 0x6a3   :  { %2919 = vmatprep.subr.bf16.mxu0 %v3359_v26 }
 0x6f2   :  { %v510_v56 = vpop.permute.xlu1 %509 }
 0x6f3   :  { %v512_v57 = vmul.f32 %v3102_v54, %v510_v56 }
 0x6f5   :  { %514 = vrot.lane.b32.xlu0 %v512_v57, %s3313_s26 }
 0x6fc   :  { %v610_v59 = vpop.permute.xlu0 %609 }
 0x6fd   :  { %v612_v60 = vmul.f32 %v3104_v58, %v610_v59 }
 0x6ff   :  { %614 = vrot.lane.b32.xlu1 %v612_v60, %s3313_s26 }
 0x700   :  { %v712_v62 = vpop.permute.xlu0 %711 }
 0x701   :  { %v714_v0 = vmul.f32 %v3106_v61, %v712_v62 }
 0x703   :  { %716 = vrot.lane.b32.xlu1 %v714_v0, %s3313_s26 }
 0x767   :  { %v515_v3 = vpop.permute.xlu0 %514 }
 0x768   :  { %v3439_v4 = vadd.f32 %v515_v3, %v507_v2 }
 0x76a   :  { %3107 = vtanh.f32 %v3439_v4 }
 0x76e   :  { %v3484_v42 = vpop.f32.mrb[4].mxu0 }
 0x76f   :  { %v3486_v43 = vpop.f32.mrb[5].mxu0 }
 0x771   :  { %v615_v7 = vpop.permute.xlu1 %614 }
 0x772   :  { %v3443_v8 = vadd.f32 %v615_v7, %v607_v6  ;;  %v3488_v44 = vpop.f32.mrb[6].mxu0 }
 0x773   :  { %v3490_v45 = vpop.f32.mrb[7].mxu0 }
 0x774   :  { %v3108_v12 = vpop.eup %3107  ;;  %3109 = vtanh.f32 %v3443_v8 }
 0x775   :  { %v717_v15 = vpop.permute.xlu1 %716  ;;  %520 = vrot.lane.b32.xlu1 %v3108_v12, %s3313_s26 }
 0x776   :  { %v3448_v16 = vadd.f32 %v717_v15, %v709_v13 }
 0x778   :  { %3111 = vtanh.f32 %v3448_v16 }
 0x77e   :  { %v3110_v29 = vpop.eup %3109 }
 0x77f   :  { %620 = vrot.lane.b32.xlu0 %v3110_v29, %s3313_s26 }
 0x782   :  { %v3112_v33 = vpop.eup %3111 }
 0x783   :  { %722 = vrot.lane.b32.xlu0 %v3112_v33, %s3313_s26 }
 0x7e7   :  { %v521_v34 = vpop.permute.xlu1 %520 }
 0x7e8   :  { %v523_v36 = vmul.f32 %v3102_v54, %v521_v34  ;;  %v169_v54 = vadd.f32 %v3426_v25, %v3354_v9 }
 0x7ea   :  { %525 = vrot.lane.b32.xlu0 %v523_v36, %s3315_s27 }
 0x7f1   :  { %v621_v37 = vpop.permute.xlu0 %620 }
 0x7f2   :  { %v623_v38 = vmul.f32 %v3104_v58, %v621_v37 }
 0x7f4   :  { %625 = vrot.lane.b32.xlu1 %v623_v38, %s3315_s27 }
 0x7f5   :  { %v723_v39 = vpop.permute.xlu0 %722 }
 0x7f6   :  { %v725_v40 = vmul.f32 %v3106_v61, %v723_v39 }
 0x7f8   :  { %727 = vrot.lane.b32.xlu1 %v725_v40, %s3315_s27 }
 0x85c   :  { %v526_v46 = vpop.permute.xlu0 %525 }
 0x85d   :  { %2793 = vmatmul.mubr.msk.f32.vlgmr.msra.gmra.mrb[8].mxu0 %vm220_vm1, %v526_v46 }
 0x85e   :  { %2921 = vmatpush1.bf16.msra.mxu0 %v3362_v31  ;;  %795 = vmatprep.mubr.f32.mxu0 %v3314_v30 }
 0x85f   :  { %2923 = vmatprep.subr.bf16.mxu0 %v3364_v32 }
 0x862   :  { %2925 = vmatpush1.bf16.msra.mxu0 %v3368_v35 }
 0x863   :  { %2933 = vmatprep.subr.bf16.mxu0 %v3390_v5 }
 0x866   :  { %v626_v47 = vpop.permute.xlu1 %625 }
 0x867   :  { %2670 = vmatmul.mubr.msk.f32.vlgmr.msra.gmra.mrb[6].mxu1 %vm220_vm1, %v626_v47 }
 0x868   :  { %2928 = vmatpush3.bf16.msra.mxu1 %v3463_v21  ;;  %2803 = vmatprep.mubr.msk.f32.mxu1 %vm3317_vm2, %v3314_v30 }
 0x869   :  { %2929 = vmatprep.subr.bf16.mxu1 %v3316_v19 }
 0x86a   :  { %v728_v48 = vpop.permute.xlu1 %727 }
 0x86b   :  { %2672 = vmatmul.mubr.msk.f32.vlgmr.msra.gmra.mrb[10].mxu0 %vm220_vm1, %v728_v48 }
 0x86c   :  { %2931 = vmatpush3.bf16.msra.mxu1 %v3471_v27  ;;  %2935 = vmatpush1.bf16.msra.mxu0 %v3392_v10 }
 0x86d   :  { %2941 = vmatprep.subr.bf16.mxu1 %v3359_v26  ;;  %2937 = vmatprep.subr.bf16.mxu0 %v3394_v11 }
 0x86e   :  { %997 = vmatprep.mubr.f32.mxu0 %v3314_v30 }
 0x870   :  { %2939 = vmatpush1.bf16.msra.mxu0 %v3398_v14 }
 0x871   :  { %2948 = vmatprep.subr.bf16.mxu0 %v3316_v19 }
 0x930   :  { %v595_v49 = vpop.f32.mrb[8].mxu0 }
 0x931   :  { %v2794_v50 = vpop.f32.mrb[9].mxu0 }
 0x93a   :  { %v695_v51 = vpop.f32.mrb[6].mxu1 }
 0x93b   :  { %v697_v52 = vpop.f32.mrb[7].mxu1 }
 0x93c   :  { %v700_v53 = vadd.f32 %v697_v52, %v3428_v28 }
 0x93e   :  { %v803_v55 = vadd.f32 %v700_v53, %v595_v49  ;;  %v797_v56 = vpop.f32.mrb[10].mxu0 }
 0x93f   :  { %v1005_v57 = vadd.f32 %v797_v56, %v169_v54  ;;  %v799_v58 = vpop.f32.mrb[11].mxu0 }
 0x940   :  { %3113 = vtanh.f32 %v803_v55  ;;  %v802_v59 = vadd.f32 %v799_v58, %v3377_v41  ;;  %v2673_v25 = vmul.f32 -1.442695, %v803_v55 }
 0x941   :  { %3115 = vtanh.f32 %v1005_v57  ;;  %v2677_v2 = vmul.f32 -1.442695, %v1005_v57 }
 0x942   :  { %v903_v60 = vadd.f32 %v802_v59, %v695_v51 }
 0x944   :  { %3117 = vtanh.f32 %v903_v60  ;;  %v2675_v3 = vmul.f32 -1.442695, %v903_v60 }
 0x945   :  { %3119 = vpow2.f32 %v2673_v25 }
 0x946   :  { %3121 = vpow2.f32 %v2677_v2 }
 0x947   :  { %3123 = vpow2.f32 %v2675_v3 }
 0x94a   :  { %v3114_v61 = vpop.eup %3113 }
 0x94b   :  { %v3116_v62 = vpop.eup %3115  ;;  %813 = vrot.lane.b32.xlu0 %v3114_v61, %s3313_s26 }
 0x94c   :  { %1015 = vrot.lane.b32.xlu1 %v3116_v62, %s3313_s26 }
 0x94e   :  { %v3118_v0 = vpop.eup %3117 }
 0x94f   :  { %913 = vrot.lane.b32.xlu0 %v3118_v0, %s3313_s26  ;;  %v3120_v6 = vpop.eup %3119  ;;  %v174_v0 = vadd.f32 %v3486_v43, %v3354_v9 }
 0x950   :  { %v3122_v7 = vpop.eup %3121  ;;  %v807_v12 = vadd.f32 1.0, %v3120_v6 }
 0x951   :  { %v3124_v13 = vpop.eup %3123  ;;  %v1009_v15 = vadd.f32 1.0, %v3122_v7 }
 0x952   :  { %3125 = vrcp.f32 %v807_v12  ;;  %v907_v17 = vadd.f32 1.0, %v3124_v13 }
 0x953   :  { %3127 = vrcp.f32 %v1009_v15 }
 0x954   :  { %3129 = vrcp.f32 %v907_v17 }
 0x95c   :  { %v3126_v1 = vpop.eup %3125 }
 0x95d   :  { %v3128_v63 = vpop.eup %3127  ;;  %v811_v34 = vmul.f32 %v3126_v1, %v3439_v4 }
 0x95e   :  { %v3130_v24 = vpop.eup %3129  ;;  %v1013_v37 = vmul.f32 %v3128_v63, %v3448_v16 }
 0x95f   :  { %v911_v46 = vmul.f32 %v3130_v24, %v3443_v8 }
 0x9bd   :  { %v814_v18 = vpop.permute.xlu0 %813 }
 0x9be   :  { %v816_v20 = vmul.f32 %v3126_v1, %v814_v18  ;;  %v1016_v22 = vpop.permute.xlu1 %1015 }
 0x9bf   :  { %v1018_v23 = vmul.f32 %v3128_v63, %v1016_v22 }
 0x9c0   :  { %818 = vrot.lane.b32.xlu1 %v816_v20, %s3313_s26 }
 0x9c1   :  { %1020 = vrot.lane.b32.xlu0 %v1018_v23, %s3313_s26  ;;  %v914_v29 = vpop.permute.xlu0 %913 }
 0x9c2   :  { %v916_v33 = vmul.f32 %v3130_v24, %v914_v29 }
 0x9c4   :  { %918 = vrot.lane.b32.xlu1 %v916_v33, %s3313_s26 }
 0xa32   :  { %v819_v36 = vpop.permute.xlu1 %818 }
 0xa33   :  { %v3523_v38 = vadd.f32 %v819_v36, %v811_v34  ;;  %v1021_v39 = vpop.permute.xlu0 %1020 }
 0xa34   :  { %v3525_v40 = vadd.f32 %v1021_v39, %v1013_v37 }
 0xa35   :  { %3131 = vtanh.f32 %v3523_v38 }
 0xa36   :  { %3133 = vtanh.f32 %v3525_v40  ;;  %v919_v47 = vpop.permute.xlu1 %918 }
 0xa37   :  { %v3530_v48 = vadd.f32 %v919_v47, %v911_v46 }
 0xa39   :  { %3135 = vtanh.f32 %v3530_v48 }
 0xa3f   :  { %v3132_v4 = vpop.eup %3131 }
 0xa40   :  { %v3134_v49 = vpop.eup %3133  ;;  %824 = vrot.lane.b32.xlu0 %v3132_v4, %s3313_s26 }
 0xa41   :  { %1026 = vrot.lane.b32.xlu1 %v3134_v49, %s3313_s26 }
 0xa43   :  { %v3136_v16 = vpop.eup %3135 }
 0xa44   :  { %924 = vrot.lane.b32.xlu0 %v3136_v16, %s3313_s26 }
 0xab2   :  { %v825_v50 = vpop.permute.xlu0 %824 }
 0xab3   :  { %v827_v51 = vmul.f32 %v3126_v1, %v825_v50  ;;  %v1027_v52 = vpop.permute.xlu1 %1026 }
 0xab4   :  { %v1029_v8 = vmul.f32 %v3128_v63, %v1027_v52 }
 0xab5   :  { %829 = vrot.lane.b32.xlu1 %v827_v51, %s3315_s27 }
 0xab6   :  { %1031 = vrot.lane.b32.xlu0 %v1029_v8, %s3315_s27  ;;  %v925_v53 = vpop.permute.xlu0 %924 }
 0xab7   :  { %v927_v54 = vmul.f32 %v3130_v24, %v925_v53 }
 0xab9   :  { %929 = vrot.lane.b32.xlu1 %v927_v54, %s3315_s27 }
 0xb27   :  { %v830_v55 = vpop.permute.xlu1 %829 }
 0xb28   :  { %2804 = vmatmul.mubr.msk.f32.vlgmr.msra.gmra.mrb[8].mxu1 %vm220_vm1, %v830_v55  ;;  %v1032_v57 = vpop.permute.xlu0 %1031 }
 0xb29   :  { %2943 = vmatpush1.bf16.msra.mxu1 %v3362_v31  ;;  %1099 = vmatprep.mubr.f32.mxu1 %v3314_v30 }
 0xb2a   :  { %2945 = vmatprep.subr.bf16.mxu1 %v3364_v32 }
 0xb2b   :  { %v930_v56 = vpop.permute.xlu1 %929 }
 0xb2c   :  { %2676 = vmatmul.mubr.msk.f32.vlgmr.msra.gmra.mrb[12].mxu0 %vm220_vm1, %v930_v56 }
 0xb2d   :  { %2947 = vmatpush1.bf16.msra.mxu1 %v3368_v35  ;;  %2950 = vmatpush3.bf16.msra.mxu0 %v3463_v21 }
 0xb2e   :  { %2951 = vmatprep.subr.bf16.mxu0 %v3316_v19  ;;  %2955 = vmatprep.subr.bf16.mxu1 %v3390_v5 }
 0xb2f   :  { %2814 = vmatprep.mubr.msk.f32.mxu0 %vm3317_vm2, %v3314_v30 }
 0xb30   :  { %2678 = vmatmul.mubr.msk.f32.vlgmr.msra.gmra.mrb[10].mxu1 %vm220_vm1, %v1032_v57 }
 0xb31   :  { %2953 = vmatpush3.bf16.msra.mxu0 %v3471_v27  ;;  %2957 = vmatpush1.bf16.msra.mxu1 %v3392_v10 }
 0xb32   :  { %2959 = vmatprep.subr.bf16.mxu1 %v3394_v11  ;;  %2963 = vmatprep.subr.bf16.mxu0 %v3359_v26 }
 0xb33   :  { %1301 = vmatprep.mubr.f32.mxu1 %v3314_v30 }
 0xb35   :  { %2961 = vmatpush1.bf16.msra.mxu1 %v3398_v14 }
 0xb36   :  { %2970 = vmatprep.subr.bf16.mxu1 %v3316_v19 }
 0xbfb   :  { %v899_v58 = vpop.f32.mrb[8].mxu1 }
 0xbfc   :  { %v2805_v59 = vpop.f32.mrb[9].mxu1 }
 0xbff   :  { %v999_v60 = vpop.f32.mrb[12].mxu0 }
 0xc00   :  { %v1001_v61 = vpop.f32.mrb[13].mxu0 }
 0xc01   :  { %v1004_v62 = vadd.f32 %v1001_v61, %v3428_v28 }
 0xc03   :  { %v1107_v25 = vadd.f32 %v1004_v62, %v899_v58  ;;  %v1101_v2 = vpop.f32.mrb[10].mxu1 }
 0xc04   :  { %v1309_v3 = vadd.f32 %v1101_v2, %v174_v0  ;;  %v1103_v6 = vpop.f32.mrb[11].mxu1 }
 0xc05   :  { %3137 = vtanh.f32 %v1107_v25  ;;  %v1106_v7 = vadd.f32 %v1103_v6, %v3377_v41  ;;  %v2679_v43 = vmul.f32 -1.442695, %v1107_v25 }
 0xc06   :  { %v2683_v18 = vmul.f32 -1.442695, %v1309_v3 }
 0xc07   :  { %v1207_v12 = vadd.f32 %v1106_v7, %v999_v60 }
 0xc09   :  { %3139 = vtanh.f32 %v1207_v12  ;;  %v2681_v1 = vmul.f32 -1.442695, %v1207_v12 }
 0xc0a   :  { %3141 = vtanh.f32 %v1309_v3 }
 0xc0b   :  { %3143 = vpow2.f32 %v2679_v43 }
 0xc0c   :  { %3145 = vpow2.f32 %v2681_v1 }
 0xc0d   :  { %3147 = vpow2.f32 %v2683_v18 }
 0xc0f   :  { %v3138_v13 = vpop.eup %3137 }
 0xc10   :  { %1117 = vrot.lane.b32.xlu1 %v3138_v13, %s3313_s26 }
 0xc13   :  { %v3140_v15 = vpop.eup %3139 }
 0xc14   :  { %1217 = vrot.lane.b32.xlu0 %v3140_v15, %s3313_s26  ;;  %v3142_v17 = vpop.eup %3141  ;;  %v179_v15 = vadd.f32 %v3484_v42, %v3354_v9 }
 0xc15   :  { %v3144_v63 = vpop.eup %3143 }
 0xc16   :  { %v1111_v20 = vadd.f32 1.0, %v3144_v63  ;;  %v3146_v22 = vpop.eup %3145 }
 0xc17   :  { %v1211_v23 = vadd.f32 1.0, %v3146_v22  ;;  %v3148_v24 = vpop.eup %3147 }
 0xc18   :  { %1319 = vrot.lane.b32.xlu0 %v3142_v17, %s3313_s26  ;;  %3149 = vrcp.f32 %v1111_v20  ;;  %v1313_v29 = vadd.f32 1.0, %v3148_v24 }
 0xc19   :  { %3151 = vrcp.f32 %v1211_v23 }
 0xc1a   :  { %3153 = vrcp.f32 %v1313_v29 }
 0xc22   :  { %v3150_v33 = vpop.eup %3149 }
 0xc23   :  { %v3152_v37 = vpop.eup %3151  ;;  %v1115_v16 = vmul.f32 %v3150_v33, %v3523_v38 }
 0xc24   :  { %v3154_v47 = vpop.eup %3153  ;;  %v1215_v52 = vmul.f32 %v3152_v37, %v3530_v48 }
 0xc25   :  { %v1317_v54 = vmul.f32 %v3154_v47, %v3525_v40 }
 0xc82   :  { %v1118_v34 = vpop.permute.xlu1 %1117 }
 0xc83   :  { %v1120_v36 = vmul.f32 %v3150_v33, %v1118_v34 }
 0xc85   :  { %1122 = vrot.lane.b32.xlu0 %v1120_v36, %s3313_s26 }
 0xc86   :  { %v1218_v39 = vpop.permute.xlu0 %1217 }
 0xc87   :  { %v1220_v46 = vmul.f32 %v3152_v37, %v1218_v39 }
 0xc89   :  { %1222 = vrot.lane.b32.xlu1 %v1220_v46, %s3313_s26 }
 0xc8a   :  { %v1320_v4 = vpop.permute.xlu0 %1319 }
 0xc8b   :  { %v1322_v49 = vmul.f32 %v3154_v47, %v1320_v4 }
 0xc8d   :  { %1324 = vrot.lane.b32.xlu1 %v1322_v49, %s3313_s26 }
 0xcf7   :  { %v1123_v50 = vpop.permute.xlu0 %1122 }
 0xcf8   :  { %v3569_v51 = vadd.f32 %v1123_v50, %v1115_v16 }
 0xcfa   :  { %3155 = vtanh.f32 %v3569_v51 }
 0xcfb   :  { %v1223_v8 = vpop.permute.xlu1 %1222 }
 0xcfc   :  { %v3573_v53 = vadd.f32 %v1223_v8, %v1215_v52 }
 0xcfe   :  { %3157 = vtanh.f32 %v3573_v53 }
 0xcff   :  { %v1325_v55 = vpop.permute.xlu1 %1324 }
 0xd00   :  { %v3577_v56 = vadd.f32 %v1325_v55, %v1317_v54 }
 0xd02   :  { %3159 = vtanh.f32 %v3577_v56 }
 0xd04   :  { %v3156_v38 = vpop.eup %3155 }
 0xd05   :  { %1128 = vrot.lane.b32.xlu1 %v3156_v38, %s3313_s26 }
 0xd08   :  { %v3158_v57 = vpop.eup %3157 }
 0xd09   :  { %1228 = vrot.lane.b32.xlu0 %v3158_v57, %s3313_s26 }
 0xd0c   :  { %v3160_v58 = vpop.eup %3159 }
 0xd0d   :  { %1330 = vrot.lane.b32.xlu0 %v3160_v58, %s3313_s26 }
 0xd77   :  { %v1129_v48 = vpop.permute.xlu1 %1128 }
 0xd78   :  { %v1131_v59 = vmul.f32 %v3150_v33, %v1129_v48 }
 0xd7a   :  { %1133 = vrot.lane.b32.xlu0 %v1131_v59, %s3315_s27 }
 0xd7b   :  { %v1229_v60 = vpop.permute.xlu0 %1228 }
 0xd7c   :  { %v1231_v40 = vmul.f32 %v3152_v37, %v1229_v60 }
 0xd7e   :  { %1233 = vrot.lane.b32.xlu1 %v1231_v40, %s3315_s27 }
 0xd7f   :  { %v1331_v61 = vpop.permute.xlu0 %1330 }
 0xd80   :  { %v1333_v62 = vmul.f32 %v3154_v47, %v1331_v61 }
 0xd82   :  { %1335 = vrot.lane.b32.xlu1 %v1333_v62, %s3315_s27 }
 0xdec   :  { %v1134_v0 = vpop.permute.xlu0 %1133 }
 0xded   :  { %2815 = vmatmul.mubr.msk.f32.vlgmr.msra.gmra.mrb[14].mxu0 %vm220_vm1, %v1134_v0 }
 0xdee   :  { %2965 = vmatpush1.bf16.msra.mxu0 %v3362_v31  ;;  %1403 = vmatprep.mubr.f32.mxu0 %v3314_v30 }
 0xdef   :  { %2967 = vmatprep.subr.bf16.mxu0 %v3364_v32 }
 0xdf0   :  { %v1234_v25 = vpop.permute.xlu1 %1233 }
 0xdf1   :  { %2682 = vmatmul.mubr.msk.f32.vlgmr.msra.gmra.mrb[12].mxu1 %vm220_vm1, %v1234_v25 }
 0xdf2   :  { %2969 = vmatpush1.bf16.msra.mxu0 %v3368_v35  ;;  %2972 = vmatpush3.bf16.msra.mxu1 %v3463_v21 }
 0xdf3   :  { %2973 = vmatprep.subr.bf16.mxu1 %v3316_v19  ;;  %2977 = vmatprep.subr.bf16.mxu0 %v3390_v5 }
 0xdf4   :  { %v1336_v2 = vpop.permute.xlu1 %1335  ;;  %2825 = vmatprep.mubr.msk.f32.mxu1 %vm3317_vm2, %v3314_v30 }
 0xdf5   :  { %2684 = vmatmul.mubr.msk.f32.vlgmr.msra.gmra.mrb[16].mxu0 %vm220_vm1, %v1336_v2 }
 0xdf6   :  { %2975 = vmatpush3.bf16.msra.mxu1 %v3471_v27  ;;  %2979 = vmatpush1.bf16.msra.mxu0 %v3392_v10 }
 0xdf7   :  { %2985 = vmatprep.subr.bf16.mxu1 %v3359_v26  ;;  %2981 = vmatprep.subr.bf16.mxu0 %v3394_v11 }
 0xdf8   :  { %1605 = vmatprep.mubr.f32.mxu0 %v3314_v30 }
 0xdfa   :  { %2983 = vmatpush1.bf16.msra.mxu0 %v3398_v14 }
 0xdfb   :  { %2992 = vmatprep.subr.bf16.mxu0 %v3316_v19 }
 0xec0   :  { %v1203_v3 = vpop.f32.mrb[14].mxu0 }
 0xec1   :  { %v2816_v6 = vpop.f32.mrb[15].mxu0 }
 0xec4   :  { %v1303_v7 = vpop.f32.mrb[12].mxu1 }
 0xec5   :  { %v1305_v12 = vpop.f32.mrb[13].mxu1 }
 0xec6   :  { %v1308_v13 = vadd.f32 %v1305_v12, %v3428_v28 }
 0xec8   :  { %v1411_v17 = vadd.f32 %v1308_v13, %v1203_v3  ;;  %v1405_v43 = vpop.f32.mrb[16].mxu0 }
 0xec9   :  { %v1613_v1 = vadd.f32 %v1405_v43, %v179_v15  ;;  %v1407_v18 = vpop.f32.mrb[17].mxu0 }
 0xeca   :  { %3161 = vtanh.f32 %v1411_v17  ;;  %v1410_v63 = vadd.f32 %v1407_v18, %v3377_v41  ;;  %v2685_v9 = vmul.f32 -1.442695, %v1411_v17 }
 0xecb   :  { %3163 = vtanh.f32 %v1613_v1  ;;  %v2689_v42 = vmul.f32 -1.442695, %v1613_v1 }
 0xecc   :  { %v1511_v20 = vadd.f32 %v1410_v63, %v1303_v7 }
 0xece   :  { %3165 = vtanh.f32 %v1511_v20  ;;  %v2687_v29 = vmul.f32 -1.442695, %v1511_v20  ;;  %v3653_v20 = vld [vmem:[#allocation2 + $0x50] ss:$0 sm:$0xff] }
 0xecf   :  { %3167 = vpow2.f32 %v2685_v9 }
 0xed0   :  { %3169 = vpow2.f32 %v2689_v42 }
 0xed1   :  { %3171 = vpow2.f32 %v2687_v29 }
 0xed4   :  { %v3162_v22 = vpop.eup %3161 }
 0xed5   :  { %v3164_v23 = vpop.eup %3163  ;;  %1421 = vrot.lane.b32.xlu0 %v3162_v22, %s3313_s26  ;;  %v184_v22 = vadd.f32 %v3653_v20, %v3490_v45 }
 0xed6   :  { %1623 = vrot.lane.b32.xlu1 %v3164_v23, %s3313_s26 }
 0xed8   :  { %v3166_v24 = vpop.eup %3165 }
 0xed9   :  { %1521 = vrot.lane.b32.xlu0 %v3166_v24, %s3313_s26  ;;  %v3168_v33 = vpop.eup %3167 }
 0xeda   :  { %v3170_v34 = vpop.eup %3169  ;;  %v1415_v36 = vadd.f32 1.0, %v3168_v33 }
 0xedb   :  { %v3172_v37 = vpop.eup %3171  ;;  %v1617_v39 = vadd.f32 1.0, %v3170_v34 }
 0xedc   :  { %3173 = vrcp.f32 %v1415_v36  ;;  %v1515_v46 = vadd.f32 1.0, %v3172_v37 }
 0xedd   :  { %3175 = vrcp.f32 %v1617_v39 }
 0xede   :  { %3177 = vrcp.f32 %v1515_v46 }
 0xee6   :  { %v3174_v47 = vpop.eup %3173 }
 0xee7   :  { %v3176_v49 = vpop.eup %3175  ;;  %v1419_v38 = vmul.f32 %v3174_v47, %v3569_v51 }
 0xee8   :  { %v3178_v8 = vpop.eup %3177  ;;  %v1621_v58 = vmul.f32 %v3176_v49, %v3577_v56 }
 0xee9   :  { %v1519_v40 = vmul.f32 %v3178_v8, %v3573_v53 }
 0xf47   :  { %v1422_v4 = vpop.permute.xlu0 %1421 }
 0xf48   :  { %v1424_v16 = vmul.f32 %v3174_v47, %v1422_v4  ;;  %v1624_v50 = vpop.permute.xlu1 %1623 }
 0xf49   :  { %v1626_v52 = vmul.f32 %v3176_v49, %v1624_v50 }
 0xf4a   :  { %1426 = vrot.lane.b32.xlu1 %v1424_v16, %s3313_s26 }
 0xf4b   :  { %1628 = vrot.lane.b32.xlu0 %v1626_v52, %s3313_s26  ;;  %v1522_v54 = vpop.permute.xlu0 %1521 }
 0xf4c   :  { %v1524_v55 = vmul.f32 %v3178_v8, %v1522_v54 }
 0xf4e   :  { %1526 = vrot.lane.b32.xlu1 %v1524_v55, %s3313_s26 }
 0xfbc   :  { %v1427_v57 = vpop.permute.xlu1 %1426 }
 0xfbd   :  { %v3617_v48 = vadd.f32 %v1427_v57, %v1419_v38  ;;  %v1629_v59 = vpop.permute.xlu0 %1628 }
 0xfbe   :  { %v3619_v60 = vadd.f32 %v1629_v59, %v1621_v58 }
 0xfbf   :  { %3179 = vtanh.f32 %v3617_v48 }
 0xfc0   :  { %3181 = vtanh.f32 %v3619_v60  ;;  %v1527_v61 = vpop.permute.xlu1 %1526 }
 0xfc1   :  { %v3624_v62 = vadd.f32 %v1527_v61, %v1519_v40 }
 0xfc3   :  { %3183 = vtanh.f32 %v3624_v62 }
 0xfc9   :  { %v3180_v51 = vpop.eup %3179 }
 0xfca   :  { %v3182_v0 = vpop.eup %3181  ;;  %1432 = vrot.lane.b32.xlu0 %v3180_v51, %s3313_s26 }
 0xfcb   :  { %1634 = vrot.lane.b32.xlu1 %v3182_v0, %s3313_s26 }
 0xfcd   :  { %v3184_v56 = vpop.eup %3183 }
 0xfce   :  { %1532 = vrot.lane.b32.xlu0 %v3184_v56, %s3313_s26 }
0x103c   :  { %v1433_v25 = vpop.permute.xlu0 %1432 }
0x103d   :  { %v1435_v2 = vmul.f32 %v3174_v47, %v1433_v25  ;;  %v1635_v3 = vpop.permute.xlu1 %1634 }
0x103e   :  { %v1637_v53 = vmul.f32 %v3176_v49, %v1635_v3 }
0x103f   :  { %1437 = vrot.lane.b32.xlu1 %v1435_v2, %s3315_s27 }
0x1040   :  { %1639 = vrot.lane.b32.xlu0 %v1637_v53, %s3315_s27  ;;  %v1533_v6 = vpop.permute.xlu0 %1532 }
0x1041   :  { %v1535_v7 = vmul.f32 %v3178_v8, %v1533_v6 }
0x1043   :  { %1537 = vrot.lane.b32.xlu1 %v1535_v7, %s3315_s27 }
0x10b1   :  { %v1438_v12 = vpop.permute.xlu1 %1437 }
0x10b2   :  { %2826 = vmatmul.mubr.msk.f32.vlgmr.msra.gmra.mrb[14].mxu1 %vm220_vm1, %v1438_v12  ;;  %v1640_v15 = vpop.permute.xlu0 %1639 }
0x10b3   :  { %2987 = vmatpush1.bf16.msra.mxu1 %v3362_v31  ;;  %1707 = vmatprep.mubr.f32.mxu1 %v3314_v30 }
0x10b4   :  { %2989 = vmatprep.subr.bf16.mxu1 %v3364_v32 }
0x10b5   :  { %v1538_v13 = vpop.permute.xlu1 %1537 }
0x10b6   :  { %2688 = vmatmul.mubr.msk.f32.vlgmr.msra.gmra.mrb[18].mxu0 %vm220_vm1, %v1538_v13 }
0x10b7   :  { %2991 = vmatpush1.bf16.msra.mxu1 %v3368_v35  ;;  %2994 = vmatpush3.bf16.msra.mxu0 %v3463_v21 }
0x10b8   :  { %2995 = vmatprep.subr.bf16.mxu0 %v3316_v19  ;;  %2999 = vmatprep.subr.bf16.mxu1 %v3390_v5 }
0x10b9   :  { %2836 = vmatprep.mubr.msk.f32.mxu0 %vm3317_vm2, %v3314_v30 }
0x10ba   :  { %2690 = vmatmul.mubr.msk.f32.vlgmr.msra.gmra.mrb[16].mxu1 %vm220_vm1, %v1640_v15 }
0x10bb   :  { %2997 = vmatpush3.bf16.msra.mxu0 %v3471_v27  ;;  %3001 = vmatpush1.bf16.msra.mxu1 %v3392_v10 }
0x10bc   :  { %3003 = vmatprep.subr.bf16.mxu1 %v3394_v11  ;;  %3007 = vmatprep.subr.bf16.mxu0 %v3359_v26 }
0x10bd   :  { %1909 = vmatprep.mubr.f32.mxu1 %v3314_v30 }
0x10bf   :  { %3005 = vmatpush1.bf16.msra.mxu1 %v3398_v14 }
0x10c0   :  { %3014 = vmatprep.subr.bf16.mxu1 %v3316_v19 }
0x1185   :  { %v1507_v17 = vpop.f32.mrb[14].mxu1 }
0x1186   :  { %v2827_v43 = vpop.f32.mrb[15].mxu1 }
0x1189   :  { %v1607_v1 = vpop.f32.mrb[18].mxu0 }
0x118a   :  { %v1609_v18 = vpop.f32.mrb[19].mxu0 }
0x118b   :  { %v1612_v63 = vadd.f32 %v1609_v18, %v3428_v28 }
0x118d   :  { %v1715_v23 = vadd.f32 %v1612_v63, %v1507_v17  ;;  %v1709_v24 = vpop.f32.mrb[16].mxu1 }
0x118e   :  { %v1917_v9 = vadd.f32 %v1709_v24, %v184_v22  ;;  %v1711_v42 = vpop.f32.mrb[17].mxu1 }
0x118f   :  { %3185 = vtanh.f32 %v1715_v23  ;;  %v1714_v29 = vadd.f32 %v1711_v42, %v3377_v41  ;;  %v2691_v45 = vmul.f32 -1.442695, %v1715_v23 }
0x1190   :  { %v2695_v46 = vmul.f32 -1.442695, %v1917_v9 }
0x1191   :  { %v1815_v33 = vadd.f32 %v1714_v29, %v1607_v1  ;;  %v189_v29 = vadd.f32 %v3653_v20, %v3488_v44 }
0x1193   :  { %3187 = vtanh.f32 %v1815_v33  ;;  %v2693_v39 = vmul.f32 -1.442695, %v1815_v33 }
0x1194   :  { %3189 = vtanh.f32 %v1917_v9 }
0x1195   :  { %3191 = vpow2.f32 %v2691_v45 }
0x1196   :  { %3193 = vpow2.f32 %v2693_v39 }
0x1197   :  { %3195 = vpow2.f32 %v2695_v46 }
0x1199   :  { %v3186_v34 = vpop.eup %3185 }
0x119a   :  { %1725 = vrot.lane.b32.xlu1 %v3186_v34, %s3313_s26 }
0x119d   :  { %v3188_v36 = vpop.eup %3187 }
0x119e   :  { %1825 = vrot.lane.b32.xlu0 %v3188_v36, %s3313_s26  ;;  %v3190_v37 = vpop.eup %3189 }
0x119f   :  { %v3192_v47 = vpop.eup %3191 }
0x11a0   :  { %v1719_v41 = vadd.f32 1.0, %v3192_v47  ;;  %v3194_v4 = vpop.eup %3193 }
0x11a1   :  { %v1819_v49 = vadd.f32 1.0, %v3194_v4  ;;  %v3196_v16 = vpop.eup %3195 }
0x11a2   :  { %1927 = vrot.lane.b32.xlu0 %v3190_v37, %s3313_s26  ;;  %3197 = vrcp.f32 %v1719_v41  ;;  %v1921_v50 = vadd.f32 1.0, %v3196_v16  ;;  %v3704_v37 = vld [vmem:[#allocation2 + $0xa0] ss:$0 sm:$0xff] }
0x11a3   :  { %3199 = vrcp.f32 %v1819_v49 }
0x11a4   :  { %3201 = vrcp.f32 %v1921_v50 }
0x11ac   :  { %v3198_v52 = vpop.eup %3197 }
0x11ad   :  { %v3200_v55 = vpop.eup %3199  ;;  %v1723_v61 = vmul.f32 %v3198_v52, %v3617_v48 }
0x11ae   :  { %v3202_v58 = vpop.eup %3201  ;;  %v1823_v56 = vmul.f32 %v3200_v55, %v3624_v62 }
0x11af   :  { %v1925_v3 = vmul.f32 %v3202_v58, %v3619_v60 }
0x120c   :  { %v1726_v8 = vpop.permute.xlu1 %1725 }
0x120d   :  { %v1728_v54 = vmul.f32 %v3198_v52, %v1726_v8 }
0x120f   :  { %1730 = vrot.lane.b32.xlu0 %v1728_v54, %s3313_s26 }
0x1210   :  { %v1826_v38 = vpop.permute.xlu0 %1825 }
0x1211   :  { %v1828_v57 = vmul.f32 %v3200_v55, %v1826_v38 }
0x1213   :  { %1830 = vrot.lane.b32.xlu1 %v1828_v57, %s3313_s26 }
0x1214   :  { %v1928_v59 = vpop.permute.xlu0 %1927 }
0x1215   :  { %v1930_v40 = vmul.f32 %v3202_v58, %v1928_v59 }
0x1217   :  { %1932 = vrot.lane.b32.xlu1 %v1930_v40, %s3313_s26 }
0x1281   :  { %v1731_v51 = vpop.permute.xlu0 %1730 }
0x1282   :  { %v3665_v0 = vadd.f32 %v1731_v51, %v1723_v61 }
0x1284   :  { %3203 = vtanh.f32 %v3665_v0 }
0x1285   :  { %v1831_v25 = vpop.permute.xlu1 %1830 }
0x1286   :  { %v3669_v2 = vadd.f32 %v1831_v25, %v1823_v56 }
0x1288   :  { %3205 = vtanh.f32 %v3669_v2 }
0x1289   :  { %v1933_v53 = vpop.permute.xlu1 %1932 }
0x128a   :  { %v3673_v6 = vadd.f32 %v1933_v53, %v1925_v3 }
0x128c   :  { %3207 = vtanh.f32 %v3673_v6 }
0x128e   :  { %v3204_v48 = vpop.eup %3203 }
0x128f   :  { %1736 = vrot.lane.b32.xlu1 %v3204_v48, %s3313_s26 }
0x1292   :  { %v3206_v7 = vpop.eup %3205 }
0x1293   :  { %1836 = vrot.lane.b32.xlu0 %v3206_v7, %s3313_s26 }
0x1296   :  { %v3208_v12 = vpop.eup %3207 }
0x1297   :  { %1938 = vrot.lane.b32.xlu0 %v3208_v12, %s3313_s26 }
0x1301   :  { %v1737_v62 = vpop.permute.xlu1 %1736 }
0x1302   :  { %v1739_v13 = vmul.f32 %v3198_v52, %v1737_v62 }
0x1304   :  { %1741 = vrot.lane.b32.xlu0 %v1739_v13, %s3315_s27 }
0x1305   :  { %v1837_v15 = vpop.permute.xlu0 %1836 }
0x1306   :  { %v1839_v60 = vmul.f32 %v3200_v55, %v1837_v15 }
0x1308   :  { %1841 = vrot.lane.b32.xlu1 %v1839_v60, %s3315_s27 }
0x1309   :  { %v1939_v17 = vpop.permute.xlu0 %1938 }
0x130a   :  { %v1941_v43 = vmul.f32 %v3202_v58, %v1939_v17 }
0x130c   :  { %1943 = vrot.lane.b32.xlu1 %v1941_v43, %s3315_s27 }
0x1376   :  { %v1742_v1 = vpop.permute.xlu0 %1741 }
0x1377   :  { %2837 = vmatmul.mubr.msk.f32.vlgmr.msra.gmra.mrb[20].mxu0 %vm220_vm1, %v1742_v1 }
0x1378   :  { %3009 = vmatpush1.bf16.msra.mxu0 %v3362_v31  ;;  %2011 = vmatprep.mubr.f32.mxu0 %v3314_v30 }
0x1379   :  { %3011 = vmatprep.subr.bf16.mxu0 %v3364_v32 }
0x137a   :  { %v1842_v18 = vpop.permute.xlu1 %1841 }
0x137b   :  { %2694 = vmatmul.mubr.msk.f32.vlgmr.msra.gmra.mrb[18].mxu1 %vm220_vm1, %v1842_v18 }
0x137c   :  { %3013 = vmatpush1.bf16.msra.mxu0 %v3368_v35  ;;  %3016 = vmatpush3.bf16.msra.mxu1 %v3463_v21 }
0x137d   :  { %3017 = vmatprep.subr.bf16.mxu1 %v3316_v19  ;;  %3021 = vmatprep.subr.bf16.mxu0 %v3390_v5 }
0x137e   :  { %v1944_v63 = vpop.permute.xlu1 %1943  ;;  %2847 = vmatprep.mubr.msk.f32.mxu1 %vm3317_vm2, %v3314_v30 }
0x137f   :  { %2696 = vmatmul.mubr.msk.f32.vlgmr.msra.gmra.mrb[22].mxu0 %vm220_vm1, %v1944_v63 }
0x1380   :  { %3019 = vmatpush3.bf16.msra.mxu1 %v3471_v27  ;;  %3023 = vmatpush1.bf16.msra.mxu0 %v3392_v10 }
0x1381   :  { %3029 = vmatprep.subr.bf16.mxu1 %v3359_v26  ;;  %3025 = vmatprep.subr.bf16.mxu0 %v3394_v11 }
0x1382   :  { %2213 = vmatprep.mubr.f32.mxu0 %v3314_v30 }
0x1384   :  { %3027 = vmatpush1.bf16.msra.mxu0 %v3398_v14 }
0x1385   :  { %3036 = vmatprep.subr.bf16.mxu0 %v3316_v19 }
0x144a   :  { %v1811_v22 = vpop.f32.mrb[20].mxu0 }
0x144b   :  { %v2838_v23 = vpop.f32.mrb[21].mxu0 }
0x144e   :  { %v1911_v24 = vpop.f32.mrb[18].mxu1 }
0x144f   :  { %v1913_v9 = vpop.f32.mrb[19].mxu1 }
0x1450   :  { %v1916_v42 = vadd.f32 %v1913_v9, %v3428_v28 }
0x1452   :  { %v2019_v33 = vadd.f32 %v1916_v42, %v1811_v22  ;;  %v2013_v34 = vpop.f32.mrb[22].mxu0 }
0x1453   :  { %v2221_v26 = vadd.f32 %v2013_v34, %v189_v29  ;;  %v2015_v36 = vpop.f32.mrb[23].mxu0 }
0x1454   :  { %3209 = vtanh.f32 %v2019_v33  ;;  %v2018_v45 = vadd.f32 %v3704_v37, %v2015_v36  ;;  %v2697_v44 = vmul.f32 -1.442695, %v2019_v33 }
0x1455   :  { %3211 = vtanh.f32 %v2221_v26  ;;  %v2701_v20 = vmul.f32 -1.442695, %v2221_v26 }
0x1456   :  { %v2119_v39 = vadd.f32 %v2018_v45, %v1911_v24 }
0x1458   :  { %3213 = vtanh.f32 %v2119_v39  ;;  %v2699_v41 = vmul.f32 -1.442695, %v2119_v39 }
0x1459   :  { %3215 = vpow2.f32 %v2697_v44 }
0x145a   :  { %3217 = vpow2.f32 %v2701_v20 }
0x145b   :  { %3219 = vpow2.f32 %v2699_v41 }
0x145e   :  { %v3210_v46 = vpop.eup %3209 }
0x145f   :  { %v3212_v47 = vpop.eup %3211  ;;  %2029 = vrot.lane.b32.xlu0 %v3210_v46, %s3313_s26 }
0x1460   :  { %2231 = vrot.lane.b32.xlu1 %v3212_v47, %s3313_s26 }
0x1462   :  { %v3214_v28 = vpop.eup %3213 }
0x1463   :  { %2129 = vrot.lane.b32.xlu0 %v3214_v28, %s3313_s26  ;;  %v3216_v4 = vpop.eup %3215 }
0x1464   :  { %v3218_v49 = vpop.eup %3217  ;;  %v2023_v16 = vadd.f32 1.0, %v3216_v4 }
0x1465   :  { %v3220_v50 = vpop.eup %3219  ;;  %v2225_v52 = vadd.f32 1.0, %v3218_v49 }
0x1466   :  { %3221 = vrcp.f32 %v2023_v16  ;;  %v2123_v8 = vadd.f32 1.0, %v3220_v50 }
0x1467   :  { %3223 = vrcp.f32 %v2225_v52 }
0x1468   :  { %3225 = vrcp.f32 %v2123_v8 }
0x1470   :  { %v3222_v54 = vpop.eup %3221 }
0x1471   :  { %v3224_v38 = vpop.eup %3223  ;;  %v2027_v56 = vmul.f32 %v3222_v54, %v3665_v0 }
0x1472   :  { %v3226_v40 = vpop.eup %3225  ;;  %v2229_v3 = vmul.f32 %v3224_v38, %v3673_v6 }
0x1473   :  { %v2127_v12 = vmul.f32 %v3226_v40, %v3669_v2 }
0x14d1   :  { %v2030_v55 = vpop.permute.xlu0 %2029 }
0x14d2   :  { %v2032_v57 = vmul.f32 %v3222_v54, %v2030_v55  ;;  %v2232_v58 = vpop.permute.xlu1 %2231 }
0x14d3   :  { %v2234_v59 = vmul.f32 %v3224_v38, %v2232_v58 }
0x14d4   :  { %2034 = vrot.lane.b32.xlu1 %v2032_v57, %s3313_s26 }
0x14d5   :  { %2236 = vrot.lane.b32.xlu0 %v2234_v59, %s3313_s26  ;;  %v2130_v61 = vpop.permute.xlu0 %2129 }
0x14d6   :  { %v2132_v51 = vmul.f32 %v3226_v40, %v2130_v61 }
0x14d8   :  { %2134 = vrot.lane.b32.xlu1 %v2132_v51, %s3313_s26 }
0x1546   :  { %v2035_v25 = vpop.permute.xlu1 %2034 }
0x1547   :  { %v3715_v53 = vadd.f32 %v2035_v25, %v2027_v56  ;;  %v2237_v48 = vpop.permute.xlu0 %2236 }
0x1548   :  { %v2239_v7 = vadd.f32 %v2237_v48, %v2229_v3 }
0x1549   :  { %3227 = vtanh.f32 %v3715_v53 }
0x154a   :  { %3229 = vtanh.f32 %v2239_v7  ;;  %v2135_v62 = vpop.permute.xlu1 %2134 }
0x154b   :  { %v3719_v13 = vadd.f32 %v2135_v62, %v2127_v12 }
0x154d   :  { %3231 = vtanh.f32 %v3719_v13 }
0x1553   :  { %v3228_v15 = vpop.eup %3227 }
0x1554   :  { %v3230_v60 = vpop.eup %3229  ;;  %2040 = vrot.lane.b32.xlu0 %v3228_v15, %s3313_s26 }
0x1555   :  { %2242 = vrot.lane.b32.xlu1 %v3230_v60, %s3313_s26 }
0x1557   :  { %v3232_v0 = vpop.eup %3231 }
0x1558   :  { %2140 = vrot.lane.b32.xlu0 %v3232_v0, %s3313_s26 }
0x15c6   :  { %v2041_v6 = vpop.permute.xlu0 %2040 }
0x15c7   :  { %v2043_v17 = vmul.f32 %v3222_v54, %v2041_v6  ;;  %v2243_v43 = vpop.permute.xlu1 %2242 }
0x15c8   :  { %v2245_v1 = vmul.f32 %v3224_v38, %v2243_v43  ;;  %v2549_v43 = vld [vmem:[#allocation2 + $0x150] sm:$0xff] }
0x15c9   :  { %2045 = vrot.lane.b32.xlu1 %v2043_v17, %s3315_s27  ;;  %v2548_v17 = vld [vmem:[#allocation2 + $0x140] sm:$0xff] }
0x15ca   :  { %2247 = vrot.lane.b32.xlu0 %v2245_v1, %s3315_s27  ;;  %v2141_v2 = vpop.permute.xlu0 %2140  ;;  %v2550_v1 = vld [vmem:[#allocation2 + $0x160] sm:$0xff] }
0x15cb   :  { %v2143_v18 = vmul.f32 %v3226_v40, %v2141_v2  ;;  %v3051_v2 = vpack.c.bf16 %v2549_v43, %v2548_v17 }
0x15cd   :  { %2145 = vrot.lane.b32.xlu1 %v2143_v18, %s3315_s27  ;;  %v2551_v18 = vld [vmem:[#allocation2 + $0x170] sm:$0xff] }
0x163b   :  { %v2046_v63 = vpop.permute.xlu1 %2045 }
0x163c   :  { %2848 = vmatmul.mubr.msk.f32.vlgmr.msra.gmra.mrb[20].mxu1 %vm220_vm1, %v2046_v63  ;;  %v2248_v23 = vpop.permute.xlu0 %2247  ;;  %v3054_v63 = vpack.c.bf16 %v2551_v18, %v2550_v1 }
0x163d   :  { %3031 = vmatpush1.bf16.msra.mxu1 %v3362_v31  ;;  %2315 = vmatprep.mubr.f32.mxu1 %v3314_v30 }
0x163e   :  { %3033 = vmatprep.subr.bf16.mxu1 %v3364_v32 }
0x163f   :  { %v2146_v22 = vpop.permute.xlu1 %2145 }
0x1640   :  { %2700 = vmatmul.mubr.msk.f32.vlgmr.msra.gmra.mrb[24].mxu0 %vm220_vm1, %v2146_v22 }
0x1641   :  { %3035 = vmatpush1.bf16.msra.mxu1 %v3368_v35  ;;  %3038 = vmatpush3.bf16.msra.mxu0 %v3463_v21  ;;  %v3261_v21 = vld [vmem:[#allocation2 + $0xf0] ss:$0 sm:$0xff] }
0x1642   :  { %3043 = vmatprep.subr.bf16.mxu1 %v3390_v5  ;;  %3039 = vmatprep.subr.bf16.mxu0 %v3316_v19 }
0x1643   :  { %2858 = vmatprep.mubr.msk.f32.mxu0 %vm3317_vm2, %v3314_v30 }
0x1644   :  { %2702 = vmatmul.mubr.msk.f32.vlgmr.msra.gmra.mrb[22].mxu1 %vm220_vm1, %v2248_v23 }
0x1645   :  { %3045 = vmatpush1.bf16.msra.mxu1 %v3392_v10  ;;  %3041 = vmatpush3.bf16.msra.mxu0 %v3471_v27 }
0x1646   :  { %3047 = vmatprep.subr.bf16.mxu1 %v3394_v11  ;;  %2516 = vmatprep.mubr.f32.mxu1 %v3314_v30 }
0x1647   :  { %3050 = vmatprep.subr.bf16.mxu0 %v3316_v19 }
0x1649   :  { %3049 = vmatpush1.bf16.msra.mxu1 %v3398_v14 }
0x170f   :  { %v2115_v31 = vpop.f32.mrb[20].mxu1 }
0x1710   :  { %v2849_v32 = vpop.f32.mrb[21].mxu1 }
0x1713   :  { %v2215_v35 = vpop.f32.mrb[24].mxu0 }
0x1714   :  { %v2217_v5 = vpop.f32.mrb[25].mxu0 }
0x1715   :  { %v2220_v24 = vadd.f32 %v3261_v21, %v2217_v5 }
0x1717   :  { %v2322_v9 = vadd.f32 %v2220_v24, %v2115_v31  ;;  %v2317_v42 = vpop.f32.mrb[22].mxu1 }
0x1718   :  { %v2318_v29 = vpop.f32.mrb[23].mxu1 }
0x1719   :  { %3233 = vtanh.f32 %v2322_v9  ;;  %v2321_v10 = vadd.f32 %v3704_v37, %v2318_v29  ;;  %v2703_v14 = vmul.f32 -1.442695, %v2322_v9 }
0x171b   :  { %v2422_v27 = vadd.f32 %v2321_v10, %v2215_v35  ;;  %v2552_v35 = vld [vmem:[#allocation2 + $0x180] ss:$0 sm:$0xff] }
0x171d   :  { %3235 = vtanh.f32 %v2422_v27  ;;  %v2705_v34 = vmul.f32 -1.442695, %v2422_v27 }
0x171e   :  { %3237 = vpow2.f32 %v2703_v14 }
0x171f   :  { %3239 = vpow2.f32 %v2705_v34 }
0x1723   :  { %v3234_v11 = vpop.eup %3233 }
0x1724   :  { %2332 = vrot.lane.b32.xlu1 %v3234_v11, %s3313_s26 }
0x1727   :  { %v3236_v33 = vpop.eup %3235 }
0x1728   :  { %2432 = vrot.lane.b32.xlu0 %v3236_v33, %s3313_s26  ;;  %v3238_v26 = vpop.eup %3237 }
0x1729   :  { %v2326_v36 = vadd.f32 1.0, %v3238_v26  ;;  %v3240_v45 = vpop.eup %3239 }
0x172a   :  { %v2426_v39 = vadd.f32 1.0, %v3240_v45 }
0x172b   :  { %3241 = vrcp.f32 %v2326_v36 }
0x172c   :  { %3243 = vrcp.f32 %v2426_v39 }
0x1735   :  { %v3242_v46 = vpop.eup %3241 }
0x1736   :  { %v3244_v28 = vpop.eup %3243  ;;  %v2330_v41 = vmul.f32 %v3242_v46, %v3715_v53 }
0x1737   :  { %v2430_v16 = vmul.f32 %v3244_v28, %v3719_v13 }
0x1796   :  { %v2333_v37 = vpop.permute.xlu1 %2332 }
0x1797   :  { %v2335_v47 = vmul.f32 %v3242_v46, %v2333_v37 }
0x1799   :  { %2337 = vrot.lane.b32.xlu1 %v2335_v47, %s3313_s26 }
0x179a   :  { %v2433_v44 = vpop.permute.xlu0 %2432 }
0x179b   :  { %v2435_v20 = vmul.f32 %v3244_v28, %v2433_v44 }
0x179d   :  { %2437 = vrot.lane.b32.xlu0 %v2435_v20, %s3313_s26 }
0x180b   :  { %v2338_v4 = vpop.permute.xlu1 %2337 }
0x180c   :  { %v2340_v49 = vadd.f32 %v2338_v4, %v2330_v41 }
0x180e   :  { %3245 = vtanh.f32 %v2340_v49 }
0x180f   :  { %v2438_v50 = vpop.permute.xlu0 %2437 }
0x1810   :  { %v2440_v52 = vadd.f32 %v2438_v50, %v2430_v16 }
0x1812   :  { %3247 = vtanh.f32 %v2440_v52 }
0x1818   :  { %v3246_v8 = vpop.eup %3245 }
0x1819   :  { %2343 = vrot.lane.b32.xlu1 %v3246_v8, %s3313_s26 }
0x181c   :  { %v3248_v54 = vpop.eup %3247 }
0x181d   :  { %2443 = vrot.lane.b32.xlu0 %v3248_v54, %s3313_s26 }
0x188b   :  { %v2344_v55 = vpop.permute.xlu1 %2343 }
0x188c   :  { %v2346_v38 = vmul.f32 %v3242_v46, %v2344_v55 }
0x188e   :  { %2348 = vrot.lane.b32.xlu1 %v2346_v38, %s3315_s27 }
0x188f   :  { %v2444_v57 = vpop.permute.xlu0 %2443 }
0x1890   :  { %v2446_v58 = vmul.f32 %v3244_v28, %v2444_v57 }
0x1892   :  { %2448 = vrot.lane.b32.xlu0 %v2446_v58, %s3315_s27 }
0x1900   :  { %v2349_v59 = vpop.permute.xlu1 %2348 }
0x1901   :  { %2859 = vmatmul.mubr.msk.f32.vlgmr.msra.gmra.mrb[26].mxu0 %vm220_vm1, %v2349_v59 }
0x1902   :  { %2869 = vmatprep.mubr.msk.f32.mxu0 %vm3317_vm2, %v3314_v30  ;;  %3052 = vmatpush3.bf16.msra.mxu0 %v3051_v2 }
0x1903   :  { %3053 = vmatprep.subr.bf16.mxu0 %v3316_v19 }
0x1904   :  { %v2449_v40 = vpop.permute.xlu0 %2448 }
0x1905   :  { %2706 = vmatmul.mubr.msk.f32.vlgmr.msra.gmra.mrb[24].mxu1 %vm220_vm1, %v2449_v40 }
0x1906   :  { %3055 = vmatpush3.bf16.msra.mxu0 %v3054_v63 }
0x19d4   :  { %v2418_v61 = vpop.f32.mrb[26].mxu0 }
0x19d5   :  { %v2860_v51 = vpop.f32.mrb[27].mxu0 }
0x19d8   :  { %v2518_v56 = vpop.f32.mrb[24].mxu1 }
0x19d9   :  { %v2519_v25 = vpop.f32.mrb[25].mxu1 }
0x19da   :  { %v2522_v3 = vadd.f32 %v3261_v21, %v2519_v25 }
0x19dc   :  { %v2523_v53 = vadd.f32 %v2522_v3, %v2418_v61 }
0x19de   :  { %3249 = vtanh.f32 %v2523_v53  ;;  %v2707_v7 = vmul.f32 -1.442695, %v2523_v53 }
0x19e0   :  { %3251 = vpow2.f32 %v2707_v7 }
0x19e8   :  { %v3250_v48 = vpop.eup %3249 }
0x19e9   :  { %2533 = vrot.lane.b32.xlu0 %v3250_v48, %s3313_s26 }
0x19ea   :  { %v3252_v12 = vpop.eup %3251 }
0x19eb   :  { %v2527_v62 = vadd.f32 1.0, %v3252_v12 }
0x19ed   :  { %3253 = vrcp.f32 %v2527_v62 }
0x19f7   :  { %v3254_v13 = vpop.eup %3253 }
0x19f8   :  { %v2531_v60 = vmul.f32 %v3254_v13, %v2340_v49 }
0x1a5b   :  { %v2534_v30 = vpop.permute.xlu0 %2533 }
0x1a5c   :  { %v2536_v15 = vmul.f32 %v3254_v13, %v2534_v30 }
0x1a5e   :  { %2538 = vrot.lane.b32.xlu1 %v2536_v15, %s3313_s26 }
0x1ad0   :  { %v2539_v0 = vpop.permute.xlu1 %2538 }
0x1ad1   :  { %v2541_v6 = vadd.f32 %v2539_v0, %v2531_v60 }
0x1ad3   :  { %3255 = vtanh.f32 %v2541_v6 }
0x1add   :  { %v3256_v22 = vpop.eup %3255 }
0x1ade   :  { %2544 = vrot.lane.b32.xlu0 %v3256_v22, %s3313_s26 }
0x1b50   :  { %v2545_v23 = vpop.permute.xlu0 %2544 }
0x1b51   :  { %v2547_v31 = vmul.f32 %v3254_v13, %v2545_v23 }
0x1b53   :  { %2554 = vrot.lane.b32.xlu1 %v2547_v31, %s3315_s27 }
0x1bc5   :  { %v2555_v32 = vpop.permute.xlu1 %2554 }
0x1bc6   :  { %2870 = vmatmul.mubr.msk.f32.vlgmr.msra.gmra.mrb[28].mxu0 %vm220_vm1, %v2555_v32 }
0x1c99   :  { %v2624_v5 = vpop.f32.mrb[28].mxu0 }
0x1c9a   :  { %v2625_v21 = vadd.f32 %v2624_v5, %v2552_v35  ;;  %v2871_v24 = vpop.f32.mrb[29].mxu0 }
0x1c9c   :  { %v2628_v9 = vmul.f32 %v2625_v21, %v2625_v21 }
0x1c9e   :  { %v2630_v42 = vsel %vm2629_vm3, %v2628_v9, 0.0 }
0x1c9f   :  { %2631 = vadd.xlane.f32.xlu0 %v2630_v42 }
0x1d2c   :  { %v2632_v19 = vpop.xlane.xlu0 %2631 }
0x1d2d   :  { %v2633_v29 = vadd.f32 1e-12, %v2632_v19 }
0x1d2f   :  { %3257 = vrsqrt.f32 %v2633_v29 }
0x1d39   :  { %v3258_v10 = vpop.eup %3257 }
0x1d3a   :  { %v2635_v27 = vmul.f32 %v3258_v10, %v2625_v21 }
0x1d3c   :  { %2637 = vst.msk [vmem:[#allocation5] sm:$0x3] %vm2636_vm4, %v2635_v27 }
0x1d3d   :  { %3295 = shalt.err (!%p3292_p12)
}
0x1d3e   :  { %s3296_s16 = scalar_lea.hbm %s3781_s2, 32 }
0x1d3f   :  { %p3297_p13 = scmp.ne.s32.totalorder %s3781_s2, %s3296_s16  ;;  %p3300_p0 = scmp.lt.u32.totalorder %s3296_s16, %s3781_s2 }
0x1d41   :  { %p3302_p1 = pnand %p3300_p0, %p3297_p13 }
0x1d43   :  { %3305 = shalt.err (!%p3302_p1)
}
0x1d44   :  { %2647 = dma.vmem_to_hbm [thread:$0]  %s2645_s12, 32, %s3781_s2, [#allocation4]  }
0x1d45   :  { %3308 = dma.done.wait [#allocation4], 32  }
0x1d46   :  { %3309 = vsyncadd [#allocation4], 4294967264 }
0x1d47   :  { %2651 = vsyncpa [#allocation3], 1 }
0x1d48   :  { %2652 = vsyncpa [#allocation4], 1 }

</bundles_post_ra>
